<compile_context>
chip_gen: v7x
topology: tpu7x:2x2x1
jax: 0.10.0
libtpu: 0.0.40
codegen_flags: <defaults>
</compile_context>

<pallas_src>
import jax
import jax.numpy as jnp
from jax import lax
from jax.experimental import pallas as pl
from jax.experimental.pallas import tpu as pltpu

_EPS = 1e-5  # float32 path: both WeightStandardizedConv2d and GroupNorm use 1e-5


# ------------------------------ kernel --------------------------------------

def _make_resnet_kernel(bt, c_in, c_out, groups, hs, ws):
    n = hs * ws
    cs = c_out // groups

    def silu(v):
        # sigmoid(x) == 0.5*(tanh(x/2)+1): SiLU entirely on the EUP, no VALU divide.
        return v * (0.5 * jnp.tanh(0.5 * v) + 0.5)

    def kernel(x_ref, ss_ref, mask_ref, w1_ref, w2_ref, wr_ref, p_ref,
               o_ref, stack_ref):
        masks = mask_ref[...]            # (9, n) f32, precomputed in wrapper
        w1 = w1_ref[...]                 # (c_out, 9*c_in)  pre-standardized, tap-major
        w2 = w2_ref[...]                 # (c_out, 9*c_out) pre-standardized, tap-major
        wr = wr_ref[...]                 # (c_out, c_in)    1x1 residual weight
        b1, g1, be1 = p_ref[:, 0:1], p_ref[:, 1:2], p_ref[:, 2:3]
        b2, g2, be2 = p_ref[:, 3:4], p_ref[:, 4:5], p_ref[:, 5:6]
        br = p_ref[:, 6:7]

        def conv3x3(xb, w_flat, bias, c):
            # xb: (c, n), n = hs*ws row-major on lanes.  3x3 conv (pad=1) as ONE
            # MXU matmul: stage 9 rolled + boundary-masked taps into the VMEM
            # scratch and contract (c_out, 9c) x (9c, n) in a single dot.
            for k in range(9):
                dy, dx = k // 3 - 1, k % 3 - 1
                d = dy * ws + dx
                sh = xb if d == 0 else pltpu.roll(xb, shift=(-d) % n, axis=1)
                stack_ref[k * c:(k + 1) * c, :] = (
                    sh * masks[k:k + 1, :]).astype(stack_ref.dtype)
            return jnp.dot(w_flat, stack_ref[:9 * c, :],
                           preferred_element_type=jnp.float32) + bias

        def group_norm(h, gamma, beta):
            # h: (c_out, n); per-group stats with E[(x-mean)^2] (matches reference,
            # avoids cancellation).  No (c,c) membership-matrix matmul.
            parts = []
            for g in range(groups):
                hg = h[g * cs:(g + 1) * cs, :]
                m = jnp.mean(hg, keepdims=True)
                v = jnp.mean(jnp.square(hg - m), keepdims=True)
                parts.append((hg - m) * lax.rsqrt(v + _EPS))
            return jnp.concatenate(parts, axis=0) * gamma + beta

        for b in range(bt):                      # static loop over the batch block
            x = x_ref[b]                         # (c_in, n), lanes = spatial
            scale = ss_ref[b, :c_out, :]         # (c_out, 1), computed in wrapper
            shift = ss_ref[b, c_out:, :]

            # block1: WS-conv -> GroupNorm -> scale/shift -> SiLU
            h = conv3x3(x, w1, b1, c_in)
            h = group_norm(h, g1, be1)
            h = h * (scale + 1.0) + shift
            h = silu(h)

            # block2: WS-conv -> GroupNorm -> SiLU
            h = conv3x3(h, w2, b2, c_out)
            h = group_norm(h, g2, be2)
            h = silu(h)

            # 1x1 residual conv (or identity weight) + add
            res = jnp.dot(wr, x.astype(wr.dtype),
                          preferred_element_type=jnp.float32) + br
            o_ref[b] = (h + res).astype(o_ref.dtype)

    return kernel


# ------------------------------ wrapper --------------------------------------

def _standardized_taps(w, dtype):
    # (c_out, c_in, 3, 3) -> weight-standardized (biased var, eps=1e-5), repacked
    # tap-major so w_flat[o, (ky*3+kx)*c_in + ci] == w_std[o, ci, ky, kx].
    mean = jnp.mean(w, axis=(1, 2, 3), keepdims=True)
    var = jnp.mean(jnp.square(w - mean), axis=(1, 2, 3), keepdims=True)
    wn = (w - mean) * lax.rsqrt(var + _EPS)
    co, ci = w.shape[0], w.shape[1]
    return wn.transpose(0, 2, 3, 1).reshape(co, 9 * ci).astype(dtype)


def _boundary_masks(hs, ws):
    lane = jnp.arange(hs * ws, dtype=jnp.int32)
    col, row = lane % ws, lane // ws
    ms = []
    for k in range(9):
        dy, dx = k // 3 - 1, k % 3 - 1
        ms.append(((col + dx >= 0) & (col + dx < ws) &
                   (row + dy >= 0) & (row + dy < hs)).astype(jnp.float32))
    return jnp.stack(ms, axis=0)              # (9, hs*ws)


def _pick_batch_block(batch):
    # Largest divisor of `batch` (capped at 8) that keeps >= 2 grid steps
    # (v7x megacore); falls back to 1.
    best = 1
    for d in range(1, batch + 1):
        if batch % d == 0 and d <= 8 and (batch // d >= 2 or batch == 1):
            best = d
    return best


def resnet_block_forward(x, time_emb, params, *, groups=8, batch_block=None,
                         mxu_dtype=jnp.float32):
    """x: (B, C_in, H, W); time_emb: (B, T) or None; params: dict of arrays.

    mxu_dtype: dtype of the matmul operands (stacked taps + conv/res weights);
    jnp.bfloat16 is recommended on v6e/v7x (accumulation stays f32).  All
    elementwise math stays f32 (required on v5e).
    """
    f32 = jnp.float32
    B, c_in, H, W = x.shape
    c_out = params["conv1_w"].shape[0]
    N = H * W
    bt = _pick_batch_block(B) if batch_block is None else batch_block
    assert B % bt == 0, "batch_block must divide batch"

    x_flat = x.reshape(B, c_in, N).astype(f32)      # lanes = spatial (lane-dense)

    # ---- hoisted weight-only / constant work (was recomputed every grid step) ----
    w1 = _standardized_taps(params["conv1_w"].astype(f32), mxu_dtype)
    w2 = _standardized_taps(params["conv2_w"].astype(f32), mxu_dtype)
    masks = _boundary_masks(H, W)

    if params.get("res_w") is not None:             # 1x1 conv residual (dim != dim_out)
        wr = params["res_w"].reshape(c_out, c_in).astype(mxu_dtype)
        res_b = params["res_b"].astype(f32)
    else:                                           # nn.Identity() residual
        wr = jnp.eye(c_out, c_in, dtype=mxu_dtype)
        res_b = jnp.zeros((c_out,), f32)

    pvec = jnp.stack(
        [params["conv1_b"], params["gn1_w"], params["gn1_b"],
         params["conv2_b"], params["gn2_w"], params["gn2_b"],
         res_b, jnp.zeros((c_out,), f32)], axis=1).astype(f32)   # (c_out, 8)

    # ---- time-MLP (SiLU -> Linear -> scale/shift) as one batched XLA matmul ----
    if time_emb is not None:
        t = time_emb.astype(f32)
        t = t * jax.nn.sigmoid(t)
        ss = t @ params["mlp_w"].T.astype(f32) + params["mlp_b"].astype(f32)
    else:
        ss = jnp.zeros((B, 2 * c_out), f32)         # scale=0, shift=0 == no scale/shift
    ss3 = ss.reshape(B, 2 * c_out, 1)

    def const_spec(a):
        nd = a.ndim
        return pl.BlockSpec(a.shape, lambda i, _nd=nd: (0,) * _nd)

    kernel = _make_resnet_kernel(bt, c_in, c_out, groups, H, W)

    out = pl.pallas_call(
        kernel,
        out_shape=jax.ShapeDtypeStruct((B, c_out, N), f32),
        grid=(B // bt,),
        in_specs=[
            pl.BlockSpec((bt, c_in, N), lambda i: (i, 0, 0)),       # x block
            pl.BlockSpec((bt, 2 * c_out, 1), lambda i: (i, 0, 0)),  # scale/shift block
            const_spec(masks), const_spec(w1), const_spec(w2),
            const_spec(wr), const_spec(pvec),
        ],
        out_specs=pl.BlockSpec((bt, c_out, N), lambda i: (i, 0, 0)),
        scratch_shapes=[pltpu.VMEM((9 * max(c_in, c_out), N), mxu_dtype)],
        compiler_params=pltpu.CompilerParams(
            dimension_semantics=("parallel",),
            vmem_limit_bytes=32 * 1024 * 1024),
    )(x_flat, ss3, masks, w1, w2, wr, pvec)

    return out.reshape(B, c_out, H, W)


# --------------------------- plain-JAX reference ----------------------------

def _ref_forward(x, time_emb, params, groups):
    eps = 1e-5
    prec = lax.Precision.HIGHEST

    def silu(v):
        return v * jax.nn.sigmoid(v)

    def ws_conv(inp, w, b):
        mean = jnp.mean(w, axis=(1, 2, 3), keepdims=True)
        var = jnp.mean(jnp.square(w - mean), axis=(1, 2, 3), keepdims=True)
        wn = (w - mean) * lax.rsqrt(var + eps)
        y = lax.conv_general_dilated(inp, wn, (1, 1), ((1, 1), (1, 1)),
                                     dimension_numbers=("NCHW", "OIHW", "NCHW"),
                                     precision=prec)
        return y + b[None, :, None, None]

    def gn(inp, gamma, beta):
        B, C, H, W = inp.shape
        xr = inp.reshape(B, groups, C // groups, H, W)
        m = jnp.mean(xr, axis=(2, 3, 4), keepdims=True)
        v = jnp.mean(jnp.square(xr - m), axis=(2, 3, 4), keepdims=True)
        xn = ((xr - m) * lax.rsqrt(v + eps)).reshape(B, C, H, W)
        return xn * gamma[None, :, None, None] + beta[None, :, None, None]

    t = silu(time_emb)
    ss = jnp.dot(t, params["mlp_w"].T, precision=prec) + params["mlp_b"]
    scale, shift = jnp.split(ss, 2, axis=1)

    h = ws_conv(x, params["conv1_w"], params["conv1_b"])
    h = gn(h, params["gn1_w"], params["gn1_b"])
    h = h * (scale[:, :, None, None] + 1.0) + shift[:, :, None, None]
    h = silu(h)

    h = ws_conv(h, params["conv2_w"], params["conv2_b"])
    h = gn(h, params["gn2_w"], params["gn2_b"])
    h = silu(h)

    res = lax.conv_general_dilated(x, params["res_w"], (1, 1), "VALID",
                                   dimension_numbers=("NCHW", "OIHW", "NCHW"),
                                   precision=prec)
    res = res + params["res_b"][None, :, None, None]
    return h + res


# --------------------------------- main --------------------------------------

if __name__ == "__main__":
    base_key = jax.random.PRNGKey(0)

    def make_params(key, c_in, c_out, T):
        ks = jax.random.split(key, 12)
        rnd = lambda k, s, sc: jax.random.normal(k, s, dtype=jnp.float32) * sc
        return {
            "conv1_w": rnd(ks[0], (c_out, c_in, 3, 3), 0.3),
            "conv1_b": rnd(ks[1], (c_out,), 0.1),
            "gn1_w": 1.0 + rnd(ks[2], (c_out,), 0.1),
            "gn1_b": rnd(ks[3], (c_out,), 0.1),
            "conv2_w": rnd(ks[4], (c_out, c_out, 3, 3), 0.3),
            "conv2_b": rnd(ks[5], (c_out,), 0.1),
            "gn2_w": 1.0 + rnd(ks[6], (c_out,), 0.1),
            "gn2_b": rnd(ks[7], (c_out,), 0.1),
            "mlp_w": rnd(ks[8], (2 * c_out, T), 0.2),
            "mlp_b": rnd(ks[9], (2 * c_out,), 0.1),
            "res_w": rnd(ks[10], (c_out, c_in, 1, 1), 0.3),
            "res_b": rnd(ks[11], (c_out,), 0.1),
        }

    def run_case(case_idx, B, c_in, c_out, H, W, T, groups):
        key = jax.random.fold_in(base_key, case_idx)
        kp, kx, kt = jax.random.split(key, 3)
        params = make_params(kp, c_in, c_out, T)
        x = jax.random.normal(kx, (B, c_in, H, W), dtype=jnp.float32)
        t = jax.random.normal(kt, (B, T), dtype=jnp.float32)

        out = resnet_block_forward(x, t, params, groups=groups)
        out = jax.block_until_ready(out)

        ref = _ref_forward(x, t, params, groups)
        assert out.shape == (B, c_out, H, W)
        err = float(jnp.max(jnp.abs(out - ref)))
        assert jnp.allclose(out, ref, atol=2e-3, rtol=2e-3), f"max|diff|={err}"

    # primary config (batch block = 1, grid length 2)
    run_case(0, B=2, c_in=4, c_out=8, H=16, W=16, T=32, groups=4)
    # batch-blocked config (batch block = 2, grid length 2) exercises Bt > 1
    run_case(1, B=4, c_in=4, c_out=8, H=16, W=16, T=32, groups=4)

    print("KERNEL_OK")
</pallas_src>

<mosaic_0001>
module attributes {stable_mosaic.version = 11 : i64} {
  func.func @kernel(%arg0: i32, %arg1: memref<1x4x256xf32, #tpu.memory_space<vmem>>, %arg2: memref<1x16x1xf32, #tpu.memory_space<vmem>>, %arg3: memref<9x256xf32, #tpu.memory_space<vmem>>, %arg4: memref<8x36xf32, #tpu.memory_space<vmem>>, %arg5: memref<8x72xf32, #tpu.memory_space<vmem>>, %arg6: memref<8x4xf32, #tpu.memory_space<vmem>>, %arg7: memref<8x8xf32, #tpu.memory_space<vmem>>, %arg8: memref<1x8x256xf32, #tpu.memory_space<vmem>>, %arg9: memref<72x256xf32, #tpu.memory_space<vmem>>) attributes {dimension_semantics = [#tpu.dimension_semantics<parallel>], iteration_bounds = array<i64: 2>, scalar_prefetch = 0 : i64, scratch_operands = 1 : i64, tpu.core_type = #tpu.core_type<tc>, window_params = [{transform_indices = @transform_0, window_bounds = array<i64: 1, 4, 256>}, {transform_indices = @transform_1, window_bounds = array<i64: 1, 16, 1>}, {pipeline_mode = #tpu.pipeline_mode<synchronous>, transform_indices = @transform_2, window_bounds = array<i64: 9, 256>}, {pipeline_mode = #tpu.pipeline_mode<synchronous>, transform_indices = @transform_3, window_bounds = array<i64: 8, 36>}, {pipeline_mode = #tpu.pipeline_mode<synchronous>, transform_indices = @transform_4, window_bounds = array<i64: 8, 72>}, {pipeline_mode = #tpu.pipeline_mode<synchronous>, transform_indices = @transform_5, window_bounds = array<i64: 8, 4>}, {pipeline_mode = #tpu.pipeline_mode<synchronous>, transform_indices = @transform_6, window_bounds = array<i64: 8, 8>}, {transform_indices = @transform_7, window_bounds = array<i64: 1, 8, 256>}]} {
    %c0 = arith.constant 0 : index
    %c0_0 = arith.constant 0 : index
    %0 = vector.load %arg3[%c0, %c0_0] : memref<9x256xf32, #tpu.memory_space<vmem>>, vector<9x256xf32>
    %c0_1 = arith.constant 0 : index
    %c0_2 = arith.constant 0 : index
    %1 = vector.load %arg4[%c0_1, %c0_2] : memref<8x36xf32, #tpu.memory_space<vmem>>, vector<8x36xf32>
    %c0_3 = arith.constant 0 : index
    %c0_4 = arith.constant 0 : index
    %2 = vector.load %arg5[%c0_3, %c0_4] : memref<8x72xf32, #tpu.memory_space<vmem>>, vector<8x72xf32>
    %c0_5 = arith.constant 0 : index
    %c0_6 = arith.constant 0 : index
    %3 = vector.load %arg6[%c0_5, %c0_6] : memref<8x4xf32, #tpu.memory_space<vmem>>, vector<8x4xf32>
    %c0_7 = arith.constant 0 : index
    %c0_8 = arith.constant 0 : index
    %4 = vector.load %arg7[%c0_7, %c0_8] : memref<8x8xf32, #tpu.memory_space<vmem>>, vector<8x1xf32>
    %c0_9 = arith.constant 0 : index
    %c1 = arith.constant 1 : index
    %5 = vector.load %arg7[%c0_9, %c1] : memref<8x8xf32, #tpu.memory_space<vmem>>, vector<8x1xf32>
    %c0_10 = arith.constant 0 : index
    %c2 = arith.constant 2 : index
    %6 = vector.load %arg7[%c0_10, %c2] : memref<8x8xf32, #tpu.memory_space<vmem>>, vector<8x1xf32>
    %c0_11 = arith.constant 0 : index
    %c3 = arith.constant 3 : index
    %7 = vector.load %arg7[%c0_11, %c3] : memref<8x8xf32, #tpu.memory_space<vmem>>, vector<8x1xf32>
    %c0_12 = arith.constant 0 : index
    %c4 = arith.constant 4 : index
    %8 = vector.load %arg7[%c0_12, %c4] : memref<8x8xf32, #tpu.memory_space<vmem>>, vector<8x1xf32>
    %c0_13 = arith.constant 0 : index
    %c5 = arith.constant 5 : index
    %9 = vector.load %arg7[%c0_13, %c5] : memref<8x8xf32, #tpu.memory_space<vmem>>, vector<8x1xf32>
    %c0_14 = arith.constant 0 : index
    %c6 = arith.constant 6 : index
    %10 = vector.load %arg7[%c0_14, %c6] : memref<8x8xf32, #tpu.memory_space<vmem>>, vector<8x1xf32>
    %c0_15 = arith.constant 0 : index
    %c0_16 = arith.constant 0 : index
    %c0_17 = arith.constant 0 : index
    %11 = vector.load %arg1[%c0_15, %c0_16, %c0_17] : memref<1x4x256xf32, #tpu.memory_space<vmem>>, vector<1x4x256xf32>
    %12 = vector.shape_cast %11 : vector<1x4x256xf32> to vector<4x256xf32>
    %c0_18 = arith.constant 0 : index
    %c0_19 = arith.constant 0 : index
    %c0_20 = arith.constant 0 : index
    %13 = vector.load %arg2[%c0_18, %c0_19, %c0_20] : memref<1x16x1xf32, #tpu.memory_space<vmem>>, vector<1x8x1xf32>
    %14 = vector.shape_cast %13 : vector<1x8x1xf32> to vector<8x1xf32>
    %c0_21 = arith.constant 0 : index
    %c8 = arith.constant 8 : index
    %c0_22 = arith.constant 0 : index
    %15 = vector.load %arg2[%c0_21, %c8, %c0_22] : memref<1x16x1xf32, #tpu.memory_space<vmem>>, vector<1x8x1xf32>
    %16 = vector.shape_cast %15 : vector<1x8x1xf32> to vector<8x1xf32>
    %c17_i32 = arith.constant 17 : i32
    %17 = tpu.dynamic_rotate %12 by %c17_i32 dim 1 : vector<4x256xf32>, i32 -> vector<4x256xf32>
    %18 = vector.extract_strided_slice %0 {offsets = [0, 0], sizes = [1, 256], strides = [1, 1]} : vector<9x256xf32> to vector<1x256xf32>
    %19 = vector.broadcast %18 : vector<1x256xf32> to vector<4x256xf32>
    %20 = arith.mulf %17, %19 : vector<4x256xf32>
    %c0_23 = arith.constant 0 : index
    %c0_24 = arith.constant 0 : index
    %21 = vector.load %arg9[%c0_23, %c0_24] : memref<72x256xf32, #tpu.memory_space<vmem>>, vector<4x256xf32>
    tpu.vector_store %arg9[%c0_23, %c0_24], %20 {strides = array<i32>} : memref<72x256xf32, #tpu.memory_space<vmem>>, vector<4x256xf32>,
    %c16_i32 = arith.constant 16 : i32
    %22 = tpu.dynamic_rotate %12 by %c16_i32 dim 1 : vector<4x256xf32>, i32 -> vector<4x256xf32>
    %23 = vector.extract_strided_slice %0 {offsets = [1, 0], sizes = [1, 256], strides = [1, 1]} : vector<9x256xf32> to vector<1x256xf32>
    %24 = vector.broadcast %23 : vector<1x256xf32> to vector<4x256xf32>
    %25 = arith.mulf %22, %24 : vector<4x256xf32>
    %c4_25 = arith.constant 4 : index
    %c0_26 = arith.constant 0 : index
    %26 = vector.load %arg9[%c4_25, %c0_26] : memref<72x256xf32, #tpu.memory_space<vmem>>, vector<4x256xf32>
    tpu.vector_store %arg9[%c4_25, %c0_26], %25 {strides = array<i32>} : memref<72x256xf32, #tpu.memory_space<vmem>>, vector<4x256xf32>,
    %c15_i32 = arith.constant 15 : i32
    %27 = tpu.dynamic_rotate %12 by %c15_i32 dim 1 : vector<4x256xf32>, i32 -> vector<4x256xf32>
    %28 = vector.extract_strided_slice %0 {offsets = [2, 0], sizes = [1, 256], strides = [1, 1]} : vector<9x256xf32> to vector<1x256xf32>
    %29 = vector.broadcast %28 : vector<1x256xf32> to vector<4x256xf32>
    %30 = arith.mulf %27, %29 : vector<4x256xf32>
    %c8_27 = arith.constant 8 : index
    %c0_28 = arith.constant 0 : index
    %31 = vector.load %arg9[%c8_27, %c0_28] : memref<72x256xf32, #tpu.memory_space<vmem>>, vector<4x256xf32>
    tpu.vector_store %arg9[%c8_27, %c0_28], %30 {strides = array<i32>} : memref<72x256xf32, #tpu.memory_space<vmem>>, vector<4x256xf32>,
    %c1_i32 = arith.constant 1 : i32
    %32 = tpu.dynamic_rotate %12 by %c1_i32 dim 1 : vector<4x256xf32>, i32 -> vector<4x256xf32>
    %33 = vector.extract_strided_slice %0 {offsets = [3, 0], sizes = [1, 256], strides = [1, 1]} : vector<9x256xf32> to vector<1x256xf32>
    %34 = vector.broadcast %33 : vector<1x256xf32> to vector<4x256xf32>
    %35 = arith.mulf %32, %34 : vector<4x256xf32>
    %c12 = arith.constant 12 : index
    %c0_29 = arith.constant 0 : index
    %36 = vector.load %arg9[%c12, %c0_29] : memref<72x256xf32, #tpu.memory_space<vmem>>, vector<4x256xf32>
    tpu.vector_store %arg9[%c12, %c0_29], %35 {strides = array<i32>} : memref<72x256xf32, #tpu.memory_space<vmem>>, vector<4x256xf32>,
    %37 = vector.extract_strided_slice %0 {offsets = [4, 0], sizes = [1, 256], strides = [1, 1]} : vector<9x256xf32> to vector<1x256xf32>
    %38 = vector.broadcast %37 : vector<1x256xf32> to vector<4x256xf32>
    %39 = arith.mulf %12, %38 : vector<4x256xf32>
    %c16 = arith.constant 16 : index
    %c0_30 = arith.constant 0 : index
    %40 = vector.load %arg9[%c16, %c0_30] : memref<72x256xf32, #tpu.memory_space<vmem>>, vector<4x256xf32>
    tpu.vector_store %arg9[%c16, %c0_30], %39 {strides = array<i32>} : memref<72x256xf32, #tpu.memory_space<vmem>>, vector<4x256xf32>,
    %c255_i32 = arith.constant 255 : i32
    %41 = tpu.dynamic_rotate %12 by %c255_i32 dim 1 : vector<4x256xf32>, i32 -> vector<4x256xf32>
    %42 = vector.extract_strided_slice %0 {offsets = [5, 0], sizes = [1, 256], strides = [1, 1]} : vector<9x256xf32> to vector<1x256xf32>
    %43 = vector.broadcast %42 : vector<1x256xf32> to vector<4x256xf32>
    %44 = arith.mulf %41, %43 : vector<4x256xf32>
    %c20 = arith.constant 20 : index
    %c0_31 = arith.constant 0 : index
    %45 = vector.load %arg9[%c20, %c0_31] : memref<72x256xf32, #tpu.memory_space<vmem>>, vector<4x256xf32>
    tpu.vector_store %arg9[%c20, %c0_31], %44 {strides = array<i32>} : memref<72x256xf32, #tpu.memory_space<vmem>>, vector<4x256xf32>,
    %c241_i32 = arith.constant 241 : i32
    %46 = tpu.dynamic_rotate %12 by %c241_i32 dim 1 : vector<4x256xf32>, i32 -> vector<4x256xf32>
    %47 = vector.extract_strided_slice %0 {offsets = [6, 0], sizes = [1, 256], strides = [1, 1]} : vector<9x256xf32> to vector<1x256xf32>
    %48 = vector.broadcast %47 : vector<1x256xf32> to vector<4x256xf32>
    %49 = arith.mulf %46, %48 : vector<4x256xf32>
    %c24 = arith.constant 24 : index
    %c0_32 = arith.constant 0 : index
    %50 = vector.load %arg9[%c24, %c0_32] : memref<72x256xf32, #tpu.memory_space<vmem>>, vector<4x256xf32>
    tpu.vector_store %arg9[%c24, %c0_32], %49 {strides = array<i32>} : memref<72x256xf32, #tpu.memory_space<vmem>>, vector<4x256xf32>,
    %c240_i32 = arith.constant 240 : i32
    %51 = tpu.dynamic_rotate %12 by %c240_i32 dim 1 : vector<4x256xf32>, i32 -> vector<4x256xf32>
    %52 = vector.extract_strided_slice %0 {offsets = [7, 0], sizes = [1, 256], strides = [1, 1]} : vector<9x256xf32> to vector<1x256xf32>
    %53 = vector.broadcast %52 : vector<1x256xf32> to vector<4x256xf32>
    %54 = arith.mulf %51, %53 : vector<4x256xf32>
    %c28 = arith.constant 28 : index
    %c0_33 = arith.constant 0 : index
    %55 = vector.load %arg9[%c28, %c0_33] : memref<72x256xf32, #tpu.memory_space<vmem>>, vector<4x256xf32>
    tpu.vector_store %arg9[%c28, %c0_33], %54 {strides = array<i32>} : memref<72x256xf32, #tpu.memory_space<vmem>>, vector<4x256xf32>,
    %c239_i32 = arith.constant 239 : i32
    %56 = tpu.dynamic_rotate %12 by %c239_i32 dim 1 : vector<4x256xf32>, i32 -> vector<4x256xf32>
    %57 = vector.extract_strided_slice %0 {offsets = [8, 0], sizes = [1, 256], strides = [1, 1]} : vector<9x256xf32> to vector<1x256xf32>
    %58 = vector.broadcast %57 : vector<1x256xf32> to vector<4x256xf32>
    %59 = arith.mulf %56, %58 : vector<4x256xf32>
    %c32 = arith.constant 32 : index
    %c0_34 = arith.constant 0 : index
    %60 = vector.load %arg9[%c32, %c0_34] : memref<72x256xf32, #tpu.memory_space<vmem>>, vector<4x256xf32>
    tpu.vector_store %arg9[%c32, %c0_34], %59 {strides = array<i32>} : memref<72x256xf32, #tpu.memory_space<vmem>>, vector<4x256xf32>,
    %c0_35 = arith.constant 0 : index
    %c0_36 = arith.constant 0 : index
    %61 = vector.load %arg9[%c0_35, %c0_36] : memref<72x256xf32, #tpu.memory_space<vmem>>, vector<36x256xf32>
    %cst = arith.constant dense<0.000000e+00> : vector<8x256xf32>
    %62 = tpu.matmul %1, %61, %cst {dimension_numbers = #tpu.dot_dimension_numbers<[1], [0], [0], [1], [0, 0, 1, 1], [], []>} : vector<8x36xf32>, vector<36x256xf32>, vector<8x256xf32> -> vector<8x256xf32>
    %63 = vector.broadcast %4 : vector<8x1xf32> to vector<8x256xf32>
    %64 = arith.addf %62, %63 : vector<8x256xf32>
    %65 = vector.extract_strided_slice %64 {offsets = [0, 0], sizes = [2, 256], strides = [1, 1]} : vector<8x256xf32> to vector<2x256xf32>
    %66 = vector.shape_cast %65 : vector<2x256xf32> to vector<1x2x256xf32>
    %cst_37 = arith.constant dense<0.000000e+00> : vector<1xf32>
    %67 = vector.multi_reduction <add>, %66, %cst_37 [1, 2] : vector<1x2x256xf32> to vector<1xf32>
    %68 = vector.shape_cast %67 : vector<1xf32> to vector<1x1x1xf32>
    %69 = vector.extract %68[0, 0, 0] : f32 from vector<1x1x1xf32>
    %70 = vector.broadcast %69 : f32 to vector<1x1xf32>
    %cst_38 = arith.constant 5.120000e+02 : f32
    %71 = vector.broadcast %cst_38 : f32 to vector<1x1xf32>
    %72 = arith.divf %70, %71 : vector<1x1xf32>
    %73 = vector.broadcast %72 : vector<1x1xf32> to vector<2x256xf32>
    %74 = arith.subf %65, %73 : vector<2x256xf32>
    %75 = arith.mulf %74, %74 : vector<2x256xf32>
    %76 = vector.shape_cast %75 : vector<2x256xf32> to vector<1x2x256xf32>
    %cst_39 = arith.constant dense<0.000000e+00> : vector<1xf32>
    %77 = vector.multi_reduction <add>, %76, %cst_39 [1, 2] : vector<1x2x256xf32> to vector<1xf32>
    %78 = vector.shape_cast %77 : vector<1xf32> to vector<1x1x1xf32>
    %79 = vector.extract %78[0, 0, 0] : f32 from vector<1x1x1xf32>
    %80 = vector.broadcast %79 : f32 to vector<1x1xf32>
    %cst_40 = arith.constant 5.120000e+02 : f32
    %81 = vector.broadcast %cst_40 : f32 to vector<1x1xf32>
    %82 = arith.divf %80, %81 : vector<1x1xf32>
    %83 = vector.broadcast %72 : vector<1x1xf32> to vector<2x256xf32>
    %84 = arith.subf %65, %83 : vector<2x256xf32>
    %cst_41 = arith.constant 9.99999974E-6 : f32
    %85 = vector.broadcast %cst_41 : f32 to vector<1x1xf32>
    %86 = arith.addf %82, %85 : vector<1x1xf32>
    %87 = math.rsqrt %86 : vector<1x1xf32>
    %88 = vector.broadcast %87 : vector<1x1xf32> to vector<2x256xf32>
    %89 = arith.mulf %84, %88 : vector<2x256xf32>
    %90 = vector.extract_strided_slice %64 {offsets = [2, 0], sizes = [2, 256], strides = [1, 1]} : vector<8x256xf32> to vector<2x256xf32>
    %91 = vector.shape_cast %90 : vector<2x256xf32> to vector<1x2x256xf32>
    %cst_42 = arith.constant dense<0.000000e+00> : vector<1xf32>
    %92 = vector.multi_reduction <add>, %91, %cst_42 [1, 2] : vector<1x2x256xf32> to vector<1xf32>
    %93 = vector.shape_cast %92 : vector<1xf32> to vector<1x1x1xf32>
    %94 = vector.extract %93[0, 0, 0] : f32 from vector<1x1x1xf32>
    %95 = vector.broadcast %94 : f32 to vector<1x1xf32>
    %cst_43 = arith.constant 5.120000e+02 : f32
    %96 = vector.broadcast %cst_43 : f32 to vector<1x1xf32>
    %97 = arith.divf %95, %96 : vector<1x1xf32>
    %98 = vector.broadcast %97 : vector<1x1xf32> to vector<2x256xf32>
    %99 = arith.subf %90, %98 : vector<2x256xf32>
    %100 = arith.mulf %99, %99 : vector<2x256xf32>
    %101 = vector.shape_cast %100 : vector<2x256xf32> to vector<1x2x256xf32>
    %cst_44 = arith.constant dense<0.000000e+00> : vector<1xf32>
    %102 = vector.multi_reduction <add>, %101, %cst_44 [1, 2] : vector<1x2x256xf32> to vector<1xf32>
    %103 = vector.shape_cast %102 : vector<1xf32> to vector<1x1x1xf32>
    %104 = vector.extract %103[0, 0, 0] : f32 from vector<1x1x1xf32>
    %105 = vector.broadcast %104 : f32 to vector<1x1xf32>
    %cst_45 = arith.constant 5.120000e+02 : f32
    %106 = vector.broadcast %cst_45 : f32 to vector<1x1xf32>
    %107 = arith.divf %105, %106 : vector<1x1xf32>
    %108 = vector.broadcast %97 : vector<1x1xf32> to vector<2x256xf32>
    %109 = arith.subf %90, %108 : vector<2x256xf32>
    %cst_46 = arith.constant 9.99999974E-6 : f32
    %110 = vector.broadcast %cst_46 : f32 to vector<1x1xf32>
    %111 = arith.addf %107, %110 : vector<1x1xf32>
    %112 = math.rsqrt %111 : vector<1x1xf32>
    %113 = vector.broadcast %112 : vector<1x1xf32> to vector<2x256xf32>
    %114 = arith.mulf %109, %113 : vector<2x256xf32>
    %115 = vector.extract_strided_slice %64 {offsets = [4, 0], sizes = [2, 256], strides = [1, 1]} : vector<8x256xf32> to vector<2x256xf32>
    %116 = vector.shape_cast %115 : vector<2x256xf32> to vector<1x2x256xf32>
    %cst_47 = arith.constant dense<0.000000e+00> : vector<1xf32>
    %117 = vector.multi_reduction <add>, %116, %cst_47 [1, 2] : vector<1x2x256xf32> to vector<1xf32>
    %118 = vector.shape_cast %117 : vector<1xf32> to vector<1x1x1xf32>
    %119 = vector.extract %118[0, 0, 0] : f32 from vector<1x1x1xf32>
    %120 = vector.broadcast %119 : f32 to vector<1x1xf32>
    %cst_48 = arith.constant 5.120000e+02 : f32
    %121 = vector.broadcast %cst_48 : f32 to vector<1x1xf32>
    %122 = arith.divf %120, %121 : vector<1x1xf32>
    %123 = vector.broadcast %122 : vector<1x1xf32> to vector<2x256xf32>
    %124 = arith.subf %115, %123 : vector<2x256xf32>
    %125 = arith.mulf %124, %124 : vector<2x256xf32>
    %126 = vector.shape_cast %125 : vector<2x256xf32> to vector<1x2x256xf32>
    %cst_49 = arith.constant dense<0.000000e+00> : vector<1xf32>
    %127 = vector.multi_reduction <add>, %126, %cst_49 [1, 2] : vector<1x2x256xf32> to vector<1xf32>
    %128 = vector.shape_cast %127 : vector<1xf32> to vector<1x1x1xf32>
    %129 = vector.extract %128[0, 0, 0] : f32 from vector<1x1x1xf32>
    %130 = vector.broadcast %129 : f32 to vector<1x1xf32>
    %cst_50 = arith.constant 5.120000e+02 : f32
    %131 = vector.broadcast %cst_50 : f32 to vector<1x1xf32>
    %132 = arith.divf %130, %131 : vector<1x1xf32>
    %133 = vector.broadcast %122 : vector<1x1xf32> to vector<2x256xf32>
    %134 = arith.subf %115, %133 : vector<2x256xf32>
    %cst_51 = arith.constant 9.99999974E-6 : f32
    %135 = vector.broadcast %cst_51 : f32 to vector<1x1xf32>
    %136 = arith.addf %132, %135 : vector<1x1xf32>
    %137 = math.rsqrt %136 : vector<1x1xf32>
    %138 = vector.broadcast %137 : vector<1x1xf32> to vector<2x256xf32>
    %139 = arith.mulf %134, %138 : vector<2x256xf32>
    %140 = vector.extract_strided_slice %64 {offsets = [6, 0], sizes = [2, 256], strides = [1, 1]} : vector<8x256xf32> to vector<2x256xf32>
    %141 = vector.shape_cast %140 : vector<2x256xf32> to vector<1x2x256xf32>
    %cst_52 = arith.constant dense<0.000000e+00> : vector<1xf32>
    %142 = vector.multi_reduction <add>, %141, %cst_52 [1, 2] : vector<1x2x256xf32> to vector<1xf32>
    %143 = vector.shape_cast %142 : vector<1xf32> to vector<1x1x1xf32>
    %144 = vector.extract %143[0, 0, 0] : f32 from vector<1x1x1xf32>
    %145 = vector.broadcast %144 : f32 to vector<1x1xf32>
    %cst_53 = arith.constant 5.120000e+02 : f32
    %146 = vector.broadcast %cst_53 : f32 to vector<1x1xf32>
    %147 = arith.divf %145, %146 : vector<1x1xf32>
    %148 = vector.broadcast %147 : vector<1x1xf32> to vector<2x256xf32>
    %149 = arith.subf %140, %148 : vector<2x256xf32>
    %150 = arith.mulf %149, %149 : vector<2x256xf32>
    %151 = vector.shape_cast %150 : vector<2x256xf32> to vector<1x2x256xf32>
    %cst_54 = arith.constant dense<0.000000e+00> : vector<1xf32>
    %152 = vector.multi_reduction <add>, %151, %cst_54 [1, 2] : vector<1x2x256xf32> to vector<1xf32>
    %153 = vector.shape_cast %152 : vector<1xf32> to vector<1x1x1xf32>
    %154 = vector.extract %153[0, 0, 0] : f32 from vector<1x1x1xf32>
    %155 = vector.broadcast %154 : f32 to vector<1x1xf32>
    %cst_55 = arith.constant 5.120000e+02 : f32
    %156 = vector.broadcast %cst_55 : f32 to vector<1x1xf32>
    %157 = arith.divf %155, %156 : vector<1x1xf32>
    %158 = vector.broadcast %147 : vector<1x1xf32> to vector<2x256xf32>
    %159 = arith.subf %140, %158 : vector<2x256xf32>
    %cst_56 = arith.constant 9.99999974E-6 : f32
    %160 = vector.broadcast %cst_56 : f32 to vector<1x1xf32>
    %161 = arith.addf %157, %160 : vector<1x1xf32>
    %162 = math.rsqrt %161 : vector<1x1xf32>
    %163 = vector.broadcast %162 : vector<1x1xf32> to vector<2x256xf32>
    %164 = arith.mulf %159, %163 : vector<2x256xf32>
    %165 = tpu.concatenate %89, %114, %139, %164 in 0 : vector<2x256xf32>, vector<2x256xf32>, vector<2x256xf32>, vector<2x256xf32> -> vector<8x256xf32>
    %166 = vector.broadcast %5 : vector<8x1xf32> to vector<8x256xf32>
    %167 = arith.mulf %165, %166 : vector<8x256xf32>
    %168 = vector.broadcast %6 : vector<8x1xf32> to vector<8x256xf32>
    %169 = arith.addf %167, %168 : vector<8x256xf32>
    %cst_57 = arith.constant 1.000000e+00 : f32
    %170 = vector.broadcast %cst_57 : f32 to vector<8x1xf32>
    %171 = arith.addf %14, %170 : vector<8x1xf32>
    %172 = vector.broadcast %171 : vector<8x1xf32> to vector<8x256xf32>
    %173 = arith.mulf %169, %172 : vector<8x256xf32>
    %174 = vector.broadcast %16 : vector<8x1xf32> to vector<8x256xf32>
    %175 = arith.addf %173, %174 : vector<8x256xf32>
    %cst_58 = arith.constant 5.000000e-01 : f32
    %176 = vector.broadcast %cst_58 : f32 to vector<8x256xf32>
    %177 = arith.mulf %176, %175 : vector<8x256xf32>
    %178 = math.tanh %177 : vector<8x256xf32>
    %cst_59 = arith.constant 5.000000e-01 : f32
    %179 = vector.broadcast %cst_59 : f32 to vector<8x256xf32>
    %180 = arith.mulf %179, %178 : vector<8x256xf32>
    %cst_60 = arith.constant 5.000000e-01 : f32
    %181 = vector.broadcast %cst_60 : f32 to vector<8x256xf32>
    %182 = arith.addf %180, %181 : vector<8x256xf32>
    %183 = arith.mulf %175, %182 : vector<8x256xf32>
    %c17_i32_61 = arith.constant 17 : i32
    %184 = tpu.dynamic_rotate %183 by %c17_i32_61 dim 1 : vector<8x256xf32>, i32 -> vector<8x256xf32>
    %185 = vector.extract_strided_slice %0 {offsets = [0, 0], sizes = [1, 256], strides = [1, 1]} : vector<9x256xf32> to vector<1x256xf32>
    %186 = vector.broadcast %185 : vector<1x256xf32> to vector<8x256xf32>
    %187 = arith.mulf %184, %186 : vector<8x256xf32>
    %c0_62 = arith.constant 0 : index
    %c0_63 = arith.constant 0 : index
    %188 = vector.load %arg9[%c0_62, %c0_63] : memref<72x256xf32, #tpu.memory_space<vmem>>, vector<8x256xf32>
    tpu.vector_store %arg9[%c0_62, %c0_63], %187 {strides = array<i32>} : memref<72x256xf32, #tpu.memory_space<vmem>>, vector<8x256xf32>,
    %c16_i32_64 = arith.constant 16 : i32
    %189 = tpu.dynamic_rotate %183 by %c16_i32_64 dim 1 : vector<8x256xf32>, i32 -> vector<8x256xf32>
    %190 = vector.extract_strided_slice %0 {offsets = [1, 0], sizes = [1, 256], strides = [1, 1]} : vector<9x256xf32> to vector<1x256xf32>
    %191 = vector.broadcast %190 : vector<1x256xf32> to vector<8x256xf32>
    %192 = arith.mulf %189, %191 : vector<8x256xf32>
    %c8_65 = arith.constant 8 : index
    %c0_66 = arith.constant 0 : index
    %193 = vector.load %arg9[%c8_65, %c0_66] : memref<72x256xf32, #tpu.memory_space<vmem>>, vector<8x256xf32>
    tpu.vector_store %arg9[%c8_65, %c0_66], %192 {strides = array<i32>} : memref<72x256xf32, #tpu.memory_space<vmem>>, vector<8x256xf32>,
    %c15_i32_67 = arith.constant 15 : i32
    %194 = tpu.dynamic_rotate %183 by %c15_i32_67 dim 1 : vector<8x256xf32>, i32 -> vector<8x256xf32>
    %195 = vector.extract_strided_slice %0 {offsets = [2, 0], sizes = [1, 256], strides = [1, 1]} : vector<9x256xf32> to vector<1x256xf32>
    %196 = vector.broadcast %195 : vector<1x256xf32> to vector<8x256xf32>
    %197 = arith.mulf %194, %196 : vector<8x256xf32>
    %c16_68 = arith.constant 16 : index
    %c0_69 = arith.constant 0 : index
    %198 = vector.load %arg9[%c16_68, %c0_69] : memref<72x256xf32, #tpu.memory_space<vmem>>, vector<8x256xf32>
    tpu.vector_store %arg9[%c16_68, %c0_69], %197 {strides = array<i32>} : memref<72x256xf32, #tpu.memory_space<vmem>>, vector<8x256xf32>,
    %c1_i32_70 = arith.constant 1 : i32
    %199 = tpu.dynamic_rotate %183 by %c1_i32_70 dim 1 : vector<8x256xf32>, i32 -> vector<8x256xf32>
    %200 = vector.extract_strided_slice %0 {offsets = [3, 0], sizes = [1, 256], strides = [1, 1]} : vector<9x256xf32> to vector<1x256xf32>
    %201 = vector.broadcast %200 : vector<1x256xf32> to vector<8x256xf32>
    %202 = arith.mulf %199, %201 : vector<8x256xf32>
    %c24_71 = arith.constant 24 : index
    %c0_72 = arith.constant 0 : index
    %203 = vector.load %arg9[%c24_71, %c0_72] : memref<72x256xf32, #tpu.memory_space<vmem>>, vector<8x256xf32>
    tpu.vector_store %arg9[%c24_71, %c0_72], %202 {strides = array<i32>} : memref<72x256xf32, #tpu.memory_space<vmem>>, vector<8x256xf32>,
    %204 = vector.extract_strided_slice %0 {offsets = [4, 0], sizes = [1, 256], strides = [1, 1]} : vector<9x256xf32> to vector<1x256xf32>
    %205 = vector.broadcast %204 : vector<1x256xf32> to vector<8x256xf32>
    %206 = arith.mulf %183, %205 : vector<8x256xf32>
    %c32_73 = arith.constant 32 : index
    %c0_74 = arith.constant 0 : index
    %207 = vector.load %arg9[%c32_73, %c0_74] : memref<72x256xf32, #tpu.memory_space<vmem>>, vector<8x256xf32>
    tpu.vector_store %arg9[%c32_73, %c0_74], %206 {strides = array<i32>} : memref<72x256xf32, #tpu.memory_space<vmem>>, vector<8x256xf32>,
    %c255_i32_75 = arith.constant 255 : i32
    %208 = tpu.dynamic_rotate %183 by %c255_i32_75 dim 1 : vector<8x256xf32>, i32 -> vector<8x256xf32>
    %209 = vector.extract_strided_slice %0 {offsets = [5, 0], sizes = [1, 256], strides = [1, 1]} : vector<9x256xf32> to vector<1x256xf32>
    %210 = vector.broadcast %209 : vector<1x256xf32> to vector<8x256xf32>
    %211 = arith.mulf %208, %210 : vector<8x256xf32>
    %c40 = arith.constant 40 : index
    %c0_76 = arith.constant 0 : index
    %212 = vector.load %arg9[%c40, %c0_76] : memref<72x256xf32, #tpu.memory_space<vmem>>, vector<8x256xf32>
    tpu.vector_store %arg9[%c40, %c0_76], %211 {strides = array<i32>} : memref<72x256xf32, #tpu.memory_space<vmem>>, vector<8x256xf32>,
    %c241_i32_77 = arith.constant 241 : i32
    %213 = tpu.dynamic_rotate %183 by %c241_i32_77 dim 1 : vector<8x256xf32>, i32 -> vector<8x256xf32>
    %214 = vector.extract_strided_slice %0 {offsets = [6, 0], sizes = [1, 256], strides = [1, 1]} : vector<9x256xf32> to vector<1x256xf32>
    %215 = vector.broadcast %214 : vector<1x256xf32> to vector<8x256xf32>
    %216 = arith.mulf %213, %215 : vector<8x256xf32>
    %c48 = arith.constant 48 : index
    %c0_78 = arith.constant 0 : index
    %217 = vector.load %arg9[%c48, %c0_78] : memref<72x256xf32, #tpu.memory_space<vmem>>, vector<8x256xf32>
    tpu.vector_store %arg9[%c48, %c0_78], %216 {strides = array<i32>} : memref<72x256xf32, #tpu.memory_space<vmem>>, vector<8x256xf32>,
    %c240_i32_79 = arith.constant 240 : i32
    %218 = tpu.dynamic_rotate %183 by %c240_i32_79 dim 1 : vector<8x256xf32>, i32 -> vector<8x256xf32>
    %219 = vector.extract_strided_slice %0 {offsets = [7, 0], sizes = [1, 256], strides = [1, 1]} : vector<9x256xf32> to vector<1x256xf32>
    %220 = vector.broadcast %219 : vector<1x256xf32> to vector<8x256xf32>
    %221 = arith.mulf %218, %220 : vector<8x256xf32>
    %c56 = arith.constant 56 : index
    %c0_80 = arith.constant 0 : index
    %222 = vector.load %arg9[%c56, %c0_80] : memref<72x256xf32, #tpu.memory_space<vmem>>, vector<8x256xf32>
    tpu.vector_store %arg9[%c56, %c0_80], %221 {strides = array<i32>} : memref<72x256xf32, #tpu.memory_space<vmem>>, vector<8x256xf32>,
    %c239_i32_81 = arith.constant 239 : i32
    %223 = tpu.dynamic_rotate %183 by %c239_i32_81 dim 1 : vector<8x256xf32>, i32 -> vector<8x256xf32>
    %224 = vector.extract_strided_slice %0 {offsets = [8, 0], sizes = [1, 256], strides = [1, 1]} : vector<9x256xf32> to vector<1x256xf32>
    %225 = vector.broadcast %224 : vector<1x256xf32> to vector<8x256xf32>
    %226 = arith.mulf %223, %225 : vector<8x256xf32>
    %c64 = arith.constant 64 : index
    %c0_82 = arith.constant 0 : index
    %227 = vector.load %arg9[%c64, %c0_82] : memref<72x256xf32, #tpu.memory_space<vmem>>, vector<8x256xf32>
    tpu.vector_store %arg9[%c64, %c0_82], %226 {strides = array<i32>} : memref<72x256xf32, #tpu.memory_space<vmem>>, vector<8x256xf32>,
    %c0_83 = arith.constant 0 : index
    %c0_84 = arith.constant 0 : index
    %228 = vector.load %arg9[%c0_83, %c0_84] : memref<72x256xf32, #tpu.memory_space<vmem>>, vector<72x256xf32>
    %cst_85 = arith.constant dense<0.000000e+00> : vector<8x256xf32>
    %229 = tpu.matmul %2, %228, %cst_85 {dimension_numbers = #tpu.dot_dimension_numbers<[1], [0], [0], [1], [0, 0, 1, 1], [], []>} : vector<8x72xf32>, vector<72x256xf32>, vector<8x256xf32> -> vector<8x256xf32>
    %230 = vector.broadcast %7 : vector<8x1xf32> to vector<8x256xf32>
    %231 = arith.addf %229, %230 : vector<8x256xf32>
    %232 = vector.extract_strided_slice %231 {offsets = [0, 0], sizes = [2, 256], strides = [1, 1]} : vector<8x256xf32> to vector<2x256xf32>
    %233 = vector.shape_cast %232 : vector<2x256xf32> to vector<1x2x256xf32>
    %cst_86 = arith.constant dense<0.000000e+00> : vector<1xf32>
    %234 = vector.multi_reduction <add>, %233, %cst_86 [1, 2] : vector<1x2x256xf32> to vector<1xf32>
    %235 = vector.shape_cast %234 : vector<1xf32> to vector<1x1x1xf32>
    %236 = vector.extract %235[0, 0, 0] : f32 from vector<1x1x1xf32>
    %237 = vector.broadcast %236 : f32 to vector<1x1xf32>
    %cst_87 = arith.constant 5.120000e+02 : f32
    %238 = vector.broadcast %cst_87 : f32 to vector<1x1xf32>
    %239 = arith.divf %237, %238 : vector<1x1xf32>
    %240 = vector.broadcast %239 : vector<1x1xf32> to vector<2x256xf32>
    %241 = arith.subf %232, %240 : vector<2x256xf32>
    %242 = arith.mulf %241, %241 : vector<2x256xf32>
    %243 = vector.shape_cast %242 : vector<2x256xf32> to vector<1x2x256xf32>
    %cst_88 = arith.constant dense<0.000000e+00> : vector<1xf32>
    %244 = vector.multi_reduction <add>, %243, %cst_88 [1, 2] : vector<1x2x256xf32> to vector<1xf32>
    %245 = vector.shape_cast %244 : vector<1xf32> to vector<1x1x1xf32>
    %246 = vector.extract %245[0, 0, 0] : f32 from vector<1x1x1xf32>
    %247 = vector.broadcast %246 : f32 to vector<1x1xf32>
    %cst_89 = arith.constant 5.120000e+02 : f32
    %248 = vector.broadcast %cst_89 : f32 to vector<1x1xf32>
    %249 = arith.divf %247, %248 : vector<1x1xf32>
    %250 = vector.broadcast %239 : vector<1x1xf32> to vector<2x256xf32>
    %251 = arith.subf %232, %250 : vector<2x256xf32>
    %cst_90 = arith.constant 9.99999974E-6 : f32
    %252 = vector.broadcast %cst_90 : f32 to vector<1x1xf32>
    %253 = arith.addf %249, %252 : vector<1x1xf32>
    %254 = math.rsqrt %253 : vector<1x1xf32>
    %255 = vector.broadcast %254 : vector<1x1xf32> to vector<2x256xf32>
    %256 = arith.mulf %251, %255 : vector<2x256xf32>
    %257 = vector.extract_strided_slice %231 {offsets = [2, 0], sizes = [2, 256], strides = [1, 1]} : vector<8x256xf32> to vector<2x256xf32>
    %258 = vector.shape_cast %257 : vector<2x256xf32> to vector<1x2x256xf32>
    %cst_91 = arith.constant dense<0.000000e+00> : vector<1xf32>
    %259 = vector.multi_reduction <add>, %258, %cst_91 [1, 2] : vector<1x2x256xf32> to vector<1xf32>
    %260 = vector.shape_cast %259 : vector<1xf32> to vector<1x1x1xf32>
    %261 = vector.extract %260[0, 0, 0] : f32 from vector<1x1x1xf32>
    %262 = vector.broadcast %261 : f32 to vector<1x1xf32>
    %cst_92 = arith.constant 5.120000e+02 : f32
    %263 = vector.broadcast %cst_92 : f32 to vector<1x1xf32>
    %264 = arith.divf %262, %263 : vector<1x1xf32>
    %265 = vector.broadcast %264 : vector<1x1xf32> to vector<2x256xf32>
    %266 = arith.subf %257, %265 : vector<2x256xf32>
    %267 = arith.mulf %266, %266 : vector<2x256xf32>
    %268 = vector.shape_cast %267 : vector<2x256xf32> to vector<1x2x256xf32>
    %cst_93 = arith.constant dense<0.000000e+00> : vector<1xf32>
    %269 = vector.multi_reduction <add>, %268, %cst_93 [1, 2] : vector<1x2x256xf32> to vector<1xf32>
    %270 = vector.shape_cast %269 : vector<1xf32> to vector<1x1x1xf32>
    %271 = vector.extract %270[0, 0, 0] : f32 from vector<1x1x1xf32>
    %272 = vector.broadcast %271 : f32 to vector<1x1xf32>
    %cst_94 = arith.constant 5.120000e+02 : f32
    %273 = vector.broadcast %cst_94 : f32 to vector<1x1xf32>
    %274 = arith.divf %272, %273 : vector<1x1xf32>
    %275 = vector.broadcast %264 : vector<1x1xf32> to vector<2x256xf32>
    %276 = arith.subf %257, %275 : vector<2x256xf32>
    %cst_95 = arith.constant 9.99999974E-6 : f32
    %277 = vector.broadcast %cst_95 : f32 to vector<1x1xf32>
    %278 = arith.addf %274, %277 : vector<1x1xf32>
    %279 = math.rsqrt %278 : vector<1x1xf32>
    %280 = vector.broadcast %279 : vector<1x1xf32> to vector<2x256xf32>
    %281 = arith.mulf %276, %280 : vector<2x256xf32>
    %282 = vector.extract_strided_slice %231 {offsets = [4, 0], sizes = [2, 256], strides = [1, 1]} : vector<8x256xf32> to vector<2x256xf32>
    %283 = vector.shape_cast %282 : vector<2x256xf32> to vector<1x2x256xf32>
    %cst_96 = arith.constant dense<0.000000e+00> : vector<1xf32>
    %284 = vector.multi_reduction <add>, %283, %cst_96 [1, 2] : vector<1x2x256xf32> to vector<1xf32>
    %285 = vector.shape_cast %284 : vector<1xf32> to vector<1x1x1xf32>
    %286 = vector.extract %285[0, 0, 0] : f32 from vector<1x1x1xf32>
    %287 = vector.broadcast %286 : f32 to vector<1x1xf32>
    %cst_97 = arith.constant 5.120000e+02 : f32
    %288 = vector.broadcast %cst_97 : f32 to vector<1x1xf32>
    %289 = arith.divf %287, %288 : vector<1x1xf32>
    %290 = vector.broadcast %289 : vector<1x1xf32> to vector<2x256xf32>
    %291 = arith.subf %282, %290 : vector<2x256xf32>
    %292 = arith.mulf %291, %291 : vector<2x256xf32>
    %293 = vector.shape_cast %292 : vector<2x256xf32> to vector<1x2x256xf32>
    %cst_98 = arith.constant dense<0.000000e+00> : vector<1xf32>
    %294 = vector.multi_reduction <add>, %293, %cst_98 [1, 2] : vector<1x2x256xf32> to vector<1xf32>
    %295 = vector.shape_cast %294 : vector<1xf32> to vector<1x1x1xf32>
    %296 = vector.extract %295[0, 0, 0] : f32 from vector<1x1x1xf32>
    %297 = vector.broadcast %296 : f32 to vector<1x1xf32>
    %cst_99 = arith.constant 5.120000e+02 : f32
    %298 = vector.broadcast %cst_99 : f32 to vector<1x1xf32>
    %299 = arith.divf %297, %298 : vector<1x1xf32>
    %300 = vector.broadcast %289 : vector<1x1xf32> to vector<2x256xf32>
    %301 = arith.subf %282, %300 : vector<2x256xf32>
    %cst_100 = arith.constant 9.99999974E-6 : f32
    %302 = vector.broadcast %cst_100 : f32 to vector<1x1xf32>
    %303 = arith.addf %299, %302 : vector<1x1xf32>
    %304 = math.rsqrt %303 : vector<1x1xf32>
    %305 = vector.broadcast %304 : vector<1x1xf32> to vector<2x256xf32>
    %306 = arith.mulf %301, %305 : vector<2x256xf32>
    %307 = vector.extract_strided_slice %231 {offsets = [6, 0], sizes = [2, 256], strides = [1, 1]} : vector<8x256xf32> to vector<2x256xf32>
    %308 = vector.shape_cast %307 : vector<2x256xf32> to vector<1x2x256xf32>
    %cst_101 = arith.constant dense<0.000000e+00> : vector<1xf32>
    %309 = vector.multi_reduction <add>, %308, %cst_101 [1, 2] : vector<1x2x256xf32> to vector<1xf32>
    %310 = vector.shape_cast %309 : vector<1xf32> to vector<1x1x1xf32>
    %311 = vector.extract %310[0, 0, 0] : f32 from vector<1x1x1xf32>
    %312 = vector.broadcast %311 : f32 to vector<1x1xf32>
    %cst_102 = arith.constant 5.120000e+02 : f32
    %313 = vector.broadcast %cst_102 : f32 to vector<1x1xf32>
    %314 = arith.divf %312, %313 : vector<1x1xf32>
    %315 = vector.broadcast %314 : vector<1x1xf32> to vector<2x256xf32>
    %316 = arith.subf %307, %315 : vector<2x256xf32>
    %317 = arith.mulf %316, %316 : vector<2x256xf32>
    %318 = vector.shape_cast %317 : vector<2x256xf32> to vector<1x2x256xf32>
    %cst_103 = arith.constant dense<0.000000e+00> : vector<1xf32>
    %319 = vector.multi_reduction <add>, %318, %cst_103 [1, 2] : vector<1x2x256xf32> to vector<1xf32>
    %320 = vector.shape_cast %319 : vector<1xf32> to vector<1x1x1xf32>
    %321 = vector.extract %320[0, 0, 0] : f32 from vector<1x1x1xf32>
    %322 = vector.broadcast %321 : f32 to vector<1x1xf32>
    %cst_104 = arith.constant 5.120000e+02 : f32
    %323 = vector.broadcast %cst_104 : f32 to vector<1x1xf32>
    %324 = arith.divf %322, %323 : vector<1x1xf32>
    %325 = vector.broadcast %314 : vector<1x1xf32> to vector<2x256xf32>
    %326 = arith.subf %307, %325 : vector<2x256xf32>
    %cst_105 = arith.constant 9.99999974E-6 : f32
    %327 = vector.broadcast %cst_105 : f32 to vector<1x1xf32>
    %328 = arith.addf %324, %327 : vector<1x1xf32>
    %329 = math.rsqrt %328 : vector<1x1xf32>
    %330 = vector.broadcast %329 : vector<1x1xf32> to vector<2x256xf32>
    %331 = arith.mulf %326, %330 : vector<2x256xf32>
    %332 = tpu.concatenate %256, %281, %306, %331 in 0 : vector<2x256xf32>, vector<2x256xf32>, vector<2x256xf32>, vector<2x256xf32> -> vector<8x256xf32>
    %333 = vector.broadcast %8 : vector<8x1xf32> to vector<8x256xf32>
    %334 = arith.mulf %332, %333 : vector<8x256xf32>
    %335 = vector.broadcast %9 : vector<8x1xf32> to vector<8x256xf32>
    %336 = arith.addf %334, %335 : vector<8x256xf32>
    %cst_106 = arith.constant 5.000000e-01 : f32
    %337 = vector.broadcast %cst_106 : f32 to vector<8x256xf32>
    %338 = arith.mulf %337, %336 : vector<8x256xf32>
    %339 = math.tanh %338 : vector<8x256xf32>
    %cst_107 = arith.constant 5.000000e-01 : f32
    %340 = vector.broadcast %cst_107 : f32 to vector<8x256xf32>
    %341 = arith.mulf %340, %339 : vector<8x256xf32>
    %cst_108 = arith.constant 5.000000e-01 : f32
    %342 = vector.broadcast %cst_108 : f32 to vector<8x256xf32>
    %343 = arith.addf %341, %342 : vector<8x256xf32>
    %344 = arith.mulf %336, %343 : vector<8x256xf32>
    %cst_109 = arith.constant dense<0.000000e+00> : vector<8x256xf32>
    %345 = tpu.matmul %3, %12, %cst_109 {dimension_numbers = #tpu.dot_dimension_numbers<[1], [0], [0], [1], [0, 0, 1, 1], [], []>} : vector<8x4xf32>, vector<4x256xf32>, vector<8x256xf32> -> vector<8x256xf32>
    %346 = vector.broadcast %10 : vector<8x1xf32> to vector<8x256xf32>
    %347 = arith.addf %345, %346 : vector<8x256xf32>
    %348 = arith.addf %344, %347 : vector<8x256xf32>
    %c0_110 = arith.constant 0 : index
    %c0_111 = arith.constant 0 : index
    %c0_112 = arith.constant 0 : index
    %349 = vector.load %arg8[%c0_110, %c0_111, %c0_112] : memref<1x8x256xf32, #tpu.memory_space<vmem>>, vector<1x8x256xf32>
    %350 = vector.shape_cast %349 : vector<1x8x256xf32> to vector<8x256xf32>
    %351 = vector.shape_cast %348 : vector<8x256xf32> to vector<1x8x256xf32>
    tpu.vector_store %arg8[%c0_110, %c0_111, %c0_112], %351 {strides = array<i32>} : memref<1x8x256xf32, #tpu.memory_space<vmem>>, vector<1x8x256xf32>,
    return
  }
  func.func @transform_0(%arg0: i32) -> (i32, i32, i32) {
    %c0_i32 = arith.constant 0 : i32
    %c0_i32_0 = arith.constant 0 : i32
    %c0_i32_1 = arith.constant 0 : i32
    return %arg0, %c0_i32, %c0_i32_0 : i32, i32, i32
  }
  func.func @transform_1(%arg0: i32) -> (i32, i32, i32) {
    %c0_i32 = arith.constant 0 : i32
    %c0_i32_0 = arith.constant 0 : i32
    %c0_i32_1 = arith.constant 0 : i32
    return %arg0, %c0_i32, %c0_i32_0 : i32, i32, i32
  }
  func.func @transform_2(%arg0: i32) -> (i32, i32) {
    %c0_i32 = arith.constant 0 : i32
    %c0_i32_0 = arith.constant 0 : i32
    %c0_i32_1 = arith.constant 0 : i32
    return %c0_i32, %c0_i32_0 : i32, i32
  }
  func.func @transform_3(%arg0: i32) -> (i32, i32) {
    %c0_i32 = arith.constant 0 : i32
    %c0_i32_0 = arith.constant 0 : i32
    %c0_i32_1 = arith.constant 0 : i32
    return %c0_i32, %c0_i32_0 : i32, i32
  }
  func.func @transform_4(%arg0: i32) -> (i32, i32) {
    %c0_i32 = arith.constant 0 : i32
    %c0_i32_0 = arith.constant 0 : i32
    %c0_i32_1 = arith.constant 0 : i32
    return %c0_i32, %c0_i32_0 : i32, i32
  }
  func.func @transform_5(%arg0: i32) -> (i32, i32) {
    %c0_i32 = arith.constant 0 : i32
    %c0_i32_0 = arith.constant 0 : i32
    %c0_i32_1 = arith.constant 0 : i32
    return %c0_i32, %c0_i32_0 : i32, i32
  }
  func.func @transform_6(%arg0: i32) -> (i32, i32) {
    %c0_i32 = arith.constant 0 : i32
    %c0_i32_0 = arith.constant 0 : i32
    %c0_i32_1 = arith.constant 0 : i32
    return %c0_i32, %c0_i32_0 : i32, i32
  }
  func.func @transform_7(%arg0: i32) -> (i32, i32, i32) {
    %c0_i32 = arith.constant 0 : i32
    %c0_i32_0 = arith.constant 0 : i32
    %c0_i32_1 = arith.constant 0 : i32
    return %arg0, %c0_i32, %c0_i32_0 : i32, i32, i32
  }
}

</mosaic_0001>

<bundles_post_ra>
// kernel: tpu_custom_call.1
= control target key start
LH: loop header
LB: loop body
LE: loop exit
PB: predicated region body
PF: predicated region fallthrough
CT: control target
= control target key end

     0   :  { %12 = vsyncpa [#allocation4], 0  ;;  %s2272_s0 = inlined_call_operand.vmem [shape: f32[2,4,256], index: 0, kind: input, shape index: {}]   ;;  %s2273_s1 = inlined_call_operand.vmem [shape: f32[2,16,1], index: 1, kind: input, shape index: {}]   ;;  %s2274_s2 = inlined_call_operand.vmem [shape: f32[9,256], index: 2, kind: input, shape index: {}]   ;;  %s2275_s3 = inlined_call_operand.vmem [shape: f32[8,36], index: 3, kind: input, shape index: {}]   ;;  %s2276_s4 = inlined_call_operand.hbm [shape: f32[8,72], index: 4, kind: input, shape index: {}]   ;;  %s2277_s5 = inlined_call_operand.vmem [shape: f32[8,4], index: 5, kind: input, shape index: {}]   ;;  %s2278_s6 = inlined_call_operand.vmem [shape: f32[8,8], index: 6, kind: input, shape index: {}]   ;;  %s2279_s7 = inlined_call_operand.hbm [shape: f32[2,8,256], index: 7, kind: output, shape index: {}]  }
   0x1   :  { %13 = vsyncpa [#allocation5], 0 }
   0x2   :  { %15 = vsyncpa [#allocation5 + $0x1], 0  ;;  %s1748_s24 = smov 0   ;;  %s1750_s25 = smov 0  }
   0x3   :  { %s1752_s26 = smov 0   ;;  %s1754_s27 = smov 0  }
   0x4 LB: > { %s1769_s28 = sadd.s32 4294967295, %s1688_s27   ;;  %s1409_s29 = sadd.s32 4294967294, %s1688_s27   ;;  %s1688_s27 = sphi %s1754_s27, %s2295_s27   ;;  %s1684_s26 = sphi %s1752_s26, %s2294_s26   ;;  %s1680_s25 = sphi %s1750_s25, %s2293_s25   ;;  %s1676_s24 = sphi %s1748_s24, %s2292_s24  }
   0x5   : > { %s1773_s30 = sadd.s32 1, %s1688_s27   ;;  %s185_s8 = sadd.s32 1, %s1684_s26 }
   0x6   : > { %s182_s9 = ssub.s32 %s1688_s27, %s1773_s30  ;;  %p195_p0 = scmp.ne.s32.totalorder %s1684_s26, %s1680_s25 }
   0x7   : > { %p183_p1 = scmp.eq.s32.totalorder %s182_s9, 0  ;;  %p196_p2 = scmp.eq.s32.totalorder %s1769_s28, 1 }
   0x8   : > { %p201_p3 = scmp.ne.s32.totalorder %s1680_s25, %s1676_s24  ;;  %p202_p4 = scmp.eq.s32.totalorder %s1409_s29, 1 }
   0x9   : > { %s1784_s10 = scalar_select %p183_p1, %s1684_s26, %s185_s8  }
   0xa   : > { %p1786_p5 = por %p196_p2, %p195_p0  ;;  %p1790_p6 = por %p202_p4, %p201_p3 }
   0xb   : > { %p1410_p7 = scmp.ge.s32.totalorder %s1688_s27, 1  ;;  %p209_p8 = scmp.lt.s32.totalorder %s1688_s27, 3 }
   0xc   : > { %s2283_s11 = scalar_select %p1786_p5, 1, 0 }
   0xd   : > { %s2284_s12 = scalar_select %p1790_p6, 1, 0 }
   0xe   : > { %p2280_p9 = scmp.eq.s32.totalorder %s1769_s28, 0  ;;  %p1797_p10 = pnand %p1410_p7, %p209_p8 }
   0xf   : > { %s1690_s14 = smov [#allocation3]   ;;  %s1594_s19 = scalar_lea.hbm %s2276_s4, 128 }
  0x10   : > { %s2285_s13 = scalar_select %p1797_p10, 1, 0 }
  0x11   : > { %s228_s15 = sshll.u32 %s1690_s14, 4  ;;  %p1499_p11 = pneg %p1797_p10  ;;  %s229_s15 = int_to_ptr.vmem [resolvable:$true] %s228_s15 }
  0x12   : > { %p1595_p13 = scmp.ne.s32.totalorder %s2276_s4, %s1594_s19  ;;  %p1601_p3 = scmp.lt.u32.totalorder %s1594_s19, %s2276_s4 }
  0x13   : > { %p1805_p12 = pnand %p2280_p9, %p1499_p11 }
  0x15   : > { %p1596_p0 = pneg %p1805_p12 }
  0x17   : > { %p1597_p1 = pnand %p1596_p0, %p1595_p13 }
  0x19   : > { %p1598_p2 = pneg %p1597_p1 }
  0x1b   : > { %p1603_p4 = pnand %p1601_p3, %p1598_p2 }
  0x1d   : > { %1606 = shalt.err (!%p1603_p4)
}
  0x1e   : > { %s1607_s29 = scalar_lea.vmem %s229_s15, 128  ;;  %p1615_p9 = scmp.lt.s32.totalorder %s229_s15, %s229_s15 }
  0x1f   : > { %p1608_p7 = scmp.ne.s32.totalorder %s229_s15, %s1607_s29  ;;  %p1616_p6 = scmp.lt.s32.totalorder %s1607_s29, %s1607_s29 }
  0x21   : > { %p1610_p8 = pnand %p1608_p7, %p1596_p0  ;;  %p1617_p5 = por %p1616_p6, %p1615_p9 }
  0x23   : > { %p1611_p11 = pneg %p1610_p8 }
  0x25   : > { %p1618_p10 = pnand %p1617_p5, %p1611_p11 }
  0x27   : > { %1621 = shalt.err (!%p1618_p10)
}
  0x28   : > { %1502 = dma.hbm_to_vmem [thread:$0]  (!%p1805_p12), %s2276_s4, 128, %s229_s15, [#allocation4]  }
  0x29   : > { %p2287_p13 = scmp.ne.s32.totalorder %s2285_s13, 0 }
  0x2a   : > { %p2288_p1 = scmp.eq.s32.totalorder (!%p2287_p13), %s1769_s28, 0 }
  0x2b   : > { %263 = sbr.rel (%p2287_p13) target bundleno = 3057 (0xbf1), region = 48 }
  0x32   : > { %1667 = dma.done.wait (%p2288_p1), [#allocation4], 128   ;;  %p2289_p0 = pmov %p2288_p1 }
  0x33   : > { %p300_p6 = scmp.lt.s32.totalorder %s1769_s28, 1  ;;  %v328_v0 = vlaneseq  ;;  %v310_v8 = vld [vmem:[%s2274_s2] sm:$0xff]  ;;  %v311_v9 = vld [vmem:[%s2274_s2 + $0x8] sm:$0xff]  ;;  %s1691_s22 = smov 1   ;;  %v1699_v33 = vmov 0.0   ;;  %v1700_v35 = vmov 0  }
  0x34   : > { %1669 = vsyncadd (%p2289_p0), [#allocation4], 4294967168  ;;  %s1692_s23 = smov 16   ;;  %s1693_s29 = smov 17   ;;  %610 = vmatprep.mubr.f32.mxu0 %v1699_v33  ;;  %1013 = vmatprep.mubr.f32.mxu1 %v1699_v33  ;;  %v1924_v34 = vld [vmem:[%s2278_s6] sm:$0xff]  ;;  %vm539_vm8 = vcmask 1043456  }
  0x35   : > { %s1833_s14 = scalar_select %p300_p6, %s1769_s28, 1  ;;  %v334_v1 = vshrl.u32 %v328_v0, 7  ;;  %1559 = vset.pattern.permute.xlu0 %v1700_v35  ;;  %v1929_v36 = vand.u32 127, %v328_v0  ;;  %vm535_vm9 = vcmask 293888   ;;  %vm617_vm10 = vcmask 1041408  }
  0x36   : > { %s1694_s8 = smov 15   ;;  %s1695_s9 = smov 127   ;;  %vm799_vm11 = vcmask 1045504   ;;  %vm945_vm12 = vcmask 588800   ;;  %vm1228_vm13 = vcmask 31744  }
  0x37   : > { %s1434_s16 = sshll.u32 %s1833_s14, 3  ;;  %v398_v2 = vsub.s32 3, %v334_v1  ;;  %v416_v3 = vsub.s32 4, %v334_v1  ;;  %v335_v4 = vsub.s32 0, %v334_v1  ;;  %v354_v5 = vsub.s32 1, %v334_v1  ;;  %s1697_s15 = smov 113  }
  0x38   : > { %s304_s17 = scalar_lea.vmem %s2272_s0, %s1434_s16  ;;  %v379_v6 = vsub.s32 2, %v334_v1  ;;  %v441_v13 = vsub.s32 5, %v334_v1  ;;  %v485_v25 = vsub.s32 7, %v334_v1  ;;  %v466_v30 = vsub.s32 6, %v334_v1  ;;  %s1696_s16 = smov 112  }
  0x39   : > { %v1840_v7 = vld [vmem:[%s304_s17] sm:$0xff]  ;;  %v1856_v11 = vrot.slane %v310_v8, %v398_v2  ;;  %v1858_v12 = vrot.slane %v311_v9, %v398_v2  ;;  %v1860_v14 = vrot.slane %v310_v8, %v416_v3  ;;  %v1862_v15 = vrot.slane %v311_v9, %v416_v3  ;;  %s1698_s13 = smov 111   ;;  %p2290_p9 = scmp.ne.s32.totalorder %s2283_s11, 0 }
  0x3a   : > { %389 = vrot.lane.b32.xlu1 %v1840_v7, %s1691_s22  ;;  %345 = vrot.lane.b32.xlu0 %v1840_v7, %s1692_s23  ;;  %v1854_v10 = vcombine.high %v1840_v7, %v1840_v7  ;;  %v1864_v16 = vrot.slane %v310_v8, %v335_v4  ;;  %v1866_v17 = vrot.slane %v311_v9, %v335_v4  ;;  %vm393_vm0 = vcmp.lt.s32.totalorder %v1929_v36, 1 }
  0x3b   : > { %v1868_v18 = vrot.slane %v310_v8, %v354_v5  ;;  %v1870_v19 = vrot.slane %v311_v9, %v354_v5  ;;  %v1872_v20 = vrot.slane %v310_v8, %v379_v6  ;;  %v1874_v21 = vrot.slane %v311_v9, %v379_v6 }
  0x3c   : > { %v424_v22 = vcombine.low %v1860_v14, %v1862_v15  ;;  %v1878_v23 = vrot.slane %v310_v8, %v441_v13  ;;  %v1880_v24 = vrot.slane %v311_v9, %v441_v13  ;;  %v1887_v27 = vrot.slane %v310_v8, %v485_v25 }
  0x3d   : > { %v1889_v28 = vrot.slane %v311_v9, %v485_v25  ;;  %v1895_v31 = vrot.slane %v310_v8, %v466_v30  ;;  %v1897_v32 = vrot.slane %v311_v9, %v466_v30  ;;  %vm330_vm1 = vcmp.lt.s32.totalorder %v1929_v36, 17 }
  0x3e   : > { %324 = vrot.lane.b32.xlu0 %v1840_v7, %s1693_s29  ;;  %391 = vrot.lane.b32.xlu1 %v1854_v10, %s1691_s22  ;;  %v426_v26 = vmul.f32 %v424_v22, %v1840_v7  ;;  %vm349_vm2 = vcmp.lt.s32.totalorder %v1929_v36, 16  ;;  %vm374_vm3 = vcmp.lt.s32.totalorder %v1929_v36, 15  ;;  %vm436_vm4 = vcmp.lt.s32.totalorder %v1929_v36, 127 }
  0x3f   : > { %vm480_vm5 = vcmp.lt.s32.totalorder %v1929_v36, 112  ;;  %vm461_vm6 = vcmp.lt.s32.totalorder %v1929_v36, 113  ;;  %vm505_vm7 = vcmp.lt.s32.totalorder %v1929_v36, 111 }
  0x40   : > { %430 = vst [vmem:[#allocation2 + $0x20] sm:$0xf] %v426_v26  ;;  %v428_v29 = vcombine.high %v426_v26, %v426_v26 }
  0x42   : > { %326 = vrot.lane.b32.xlu1 %v1854_v10, %s1693_s29  ;;  %347 = vrot.lane.b32.xlu0 %v1854_v10, %s1692_s23  ;;  %431 = vst [vmem:[#allocation2 + $0x28] sm:$0xf] %v428_v29 }
  0x46   : > { %372 = vrot.lane.b32.xlu1 %v1854_v10, %s1694_s8  ;;  %370 = vrot.lane.b32.xlu0 %v1840_v7, %s1694_s8 }
  0x4a   : > { %434 = vrot.lane.b32.xlu1 %v1854_v10, %s1695_s9  ;;  %432 = vrot.lane.b32.xlu0 %v1840_v7, %s1695_s9 }
  0x4e   : > { %478 = vrot.lane.b32.xlu1 %v1854_v10, %s1696_s16  ;;  %476 = vrot.lane.b32.xlu0 %v1840_v7, %s1696_s16 }
  0x52   : > { %459 = vrot.lane.b32.xlu1 %v1854_v10, %s1697_s15  ;;  %457 = vrot.lane.b32.xlu0 %v1840_v7, %s1697_s15 }
  0x56   : > { %503 = vrot.lane.b32.xlu1 %v1854_v10, %s1698_s13  ;;  %501 = vrot.lane.b32.xlu0 %v1840_v7, %s1698_s13 }
  0x5a   : > { %532 = vperm.xlu0 %1559, %v1924_v34  }
  0xac   : > { %v390_v37 = vpop.permute.xlu1 %389  ;;  %v346_v38 = vpop.permute.xlu0 %345 }
  0xb0   : > { %v325_v39 = vpop.permute.xlu0 %324  ;;  %v392_v40 = vpop.permute.xlu1 %391 }
  0xb1   : > { %v394_v41 = vsel %vm393_vm0, %v390_v37, %v392_v40  ;;  %v395_v42 = vsel %vm393_vm0, %v392_v40, %v390_v37 }
  0xb2   : > { %v404_v43 = vmul.f32 %v1856_v11, %v395_v42  ;;  %v405_v44 = vmul.f32 %v1858_v12, %v394_v41 }
  0xb4   : > { %v408_v45 = vrot.slane %v404_v43, 4  ;;  %v409_v46 = vrot.slane %v405_v44, 4  ;;  %v327_v47 = vpop.permute.xlu1 %326  ;;  %v348_v48 = vpop.permute.xlu0 %347 }
  0xb5   : > { %v331_v49 = vsel %vm330_vm1, %v325_v39, %v327_v47  ;;  %v332_v50 = vsel %vm330_vm1, %v327_v47, %v325_v39  ;;  %v350_v51 = vsel %vm349_vm2, %v346_v38, %v348_v48  ;;  %v351_v52 = vsel %vm349_vm2, %v348_v48, %v346_v38 }
  0xb6   : > { %412 = vst [vmem:[#allocation2 + $0x10] sm:$0xf0] %v408_v45  ;;  %413 = vst [vmem:[#allocation2 + $0x18] sm:$0xf0] %v409_v46  ;;  %v341_v53 = vmul.f32 %v1864_v16, %v332_v50  ;;  %v342_v54 = vmul.f32 %v1866_v17, %v331_v49  ;;  %v360_v55 = vmul.f32 %v1868_v18, %v351_v52  ;;  %v1989_v52 = vld [vmem:[%s2274_s2 + $0x18] ss:$0 sm:$0xff] }
  0xb7   : > { %v361_v56 = vmul.f32 %v1870_v19, %v350_v51  ;;  %v1984_v51 = vld [vmem:[%s2274_s2 + $0x10] ss:$0 sm:$0xff] }
  0xb8   : > { %343 = vst [vmem:[#allocation2] sm:$0xf] %v341_v53  ;;  %344 = vst [vmem:[#allocation2 + $0x8] sm:$0xf] %v342_v54  ;;  %v364_v57 = vrot.slane %v360_v55, 4  ;;  %v373_v59 = vpop.permute.xlu1 %372  ;;  %v371_v60 = vpop.permute.xlu0 %370 }
  0xb9   : > { %v365_v58 = vrot.slane %v361_v56, 4  ;;  %v375_v61 = vsel %vm374_vm3, %v371_v60, %v373_v59  ;;  %v376_v62 = vsel %vm374_vm3, %v373_v59, %v371_v60 }
  0xba   : > { %368 = vst [vmem:[#allocation2] sm:$0xf0] %v364_v57  ;;  %v385_v63 = vmul.f32 %v1872_v20, %v376_v62  ;;  %v386_v0 = vmul.f32 %v1874_v21, %v375_v61 }
  0xbb   : > { %369 = vst [vmem:[#allocation2 + $0x8] sm:$0xf0] %v365_v58 }
  0xbc   : > { %387 = vst [vmem:[#allocation2 + $0x10] sm:$0xf] %v385_v63  ;;  %388 = vst [vmem:[#allocation2 + $0x18] sm:$0xf] %v386_v0  ;;  %v435_v1 = vpop.permute.xlu1 %434  ;;  %v433_v2 = vpop.permute.xlu0 %432 }
  0xbd   : > { %v437_v3 = vsel %vm436_vm4, %v433_v2, %v435_v1  ;;  %v438_v4 = vsel %vm436_vm4, %v435_v1, %v433_v2 }
  0xbe   : > { %v447_v5 = vmul.f32 %v1878_v23, %v437_v3  ;;  %v448_v6 = vmul.f32 %v1880_v24, %v438_v4  ;;  %v314_v3 = vld [vmem:[%s2275_s3] sm:$0xff] }
  0xc0   : > { %v451_v8 = vrot.slane %v447_v5, 4  ;;  %v452_v9 = vrot.slane %v448_v6, 4  ;;  %v479_v13 = vpop.permute.xlu1 %478  ;;  %v477_v22 = vpop.permute.xlu0 %476 }
  0xc1   : > { %v481_v25 = vsel %vm480_vm5, %v477_v22, %v479_v13  ;;  %v482_v26 = vsel %vm480_vm5, %v479_v13, %v477_v22  ;;  %v520_v39 = vld [vmem:[#allocation2] sm:$0xff] }
  0xc2   : > { %455 = vst [vmem:[#allocation2 + $0x20] sm:$0xf0] %v451_v8  ;;  %456 = vst [vmem:[#allocation2 + $0x28] sm:$0xf0] %v452_v9  ;;  %v491_v29 = vmul.f32 %v1887_v27, %v481_v25  ;;  %v492_v30 = vmul.f32 %v1889_v28, %v482_v26  ;;  %v521_v37 = vld [vmem:[#allocation2 + $0x8] sm:$0xff] }
  0xc3   : > { %v523_v38 = vld [vmem:[#allocation2 + $0x18] sm:$0xff]  ;;  %v522_v40 = vld [vmem:[#allocation2 + $0x10] sm:$0xff] }
  0xc4   : > { %v495_v41 = vrot.slane %v491_v29, 4  ;;  %v496_v42 = vrot.slane %v492_v30, 4  ;;  %v460_v43 = vpop.permute.xlu1 %459  ;;  %v458_v44 = vpop.permute.xlu0 %457  ;;  %v1437_v45 = vpack.c.bf16 %v523_v38, %v521_v37  ;;  %v1439_v46 = vpack.c.bf16 %v522_v40, %v520_v39 }
  0xc5   : > { %v462_v47 = vsel %vm461_vm6, %v458_v44, %v460_v43  ;;  %v463_v48 = vsel %vm461_vm6, %v460_v43, %v458_v44 }
  0xc6   : > { %499 = vst [vmem:[#allocation2 + $0x30] sm:$0xf0] %v495_v41  ;;  %500 = vst [vmem:[#allocation2 + $0x38] sm:$0xf0] %v496_v42  ;;  %v472_v49 = vmul.f32 %v1895_v31, %v462_v47  ;;  %v473_v50 = vmul.f32 %v1897_v32, %v463_v48  ;;  %1438 = vmatprep.subr.bf16.mxu0 %v1437_v45 }
  0xc7   : > { %1440 = vmatpush1.bf16.msra.mxu0 %v1439_v46 }
  0xc8   : > { %474 = vst [vmem:[#allocation2 + $0x30] sm:$0xf] %v472_v49  ;;  %475 = vst [vmem:[#allocation2 + $0x38] sm:$0xf] %v473_v50  ;;  %v504_v53 = vpop.permute.xlu1 %503  ;;  %v502_v54 = vpop.permute.xlu0 %501 }
  0xc9   : > { %v506_v55 = vsel %vm505_vm7, %v502_v54, %v504_v53  ;;  %v507_v56 = vsel %vm505_vm7, %v504_v53, %v502_v54  ;;  %v525_v59 = vld [vmem:[#allocation2 + $0x28] sm:$0xff]  ;;  %v524_v61 = vld [vmem:[#allocation2 + $0x20] sm:$0xff] }
  0xca   : > { %v516_v57 = vmul.f32 %v1984_v51, %v506_v55  ;;  %v517_v58 = vmul.f32 %v1989_v52, %v507_v56 }
  0xcc   : > { %518 = vst [vmem:[#allocation2 + $0x40] sm:$0xf] %v516_v57  ;;  %519 = vst [vmem:[#allocation2 + $0x48] sm:$0xf] %v517_v58 }
  0xcf   : > { %v527_v60 = vld [vmem:[#allocation2 + $0x38] sm:$0xff]  ;;  %v526_v62 = vld [vmem:[#allocation2 + $0x30] sm:$0xff] }
  0xd0   : > { %v1441_v63 = vpack.c.bf16 %v527_v60, %v525_v59  ;;  %v1443_v0 = vpack.c.bf16 %v526_v62, %v524_v61 }
  0xd2   : > { %1442 = vmatprep.subr.bf16.mxu0 %v1441_v63 }
  0xd3   : > { %1444 = vmatpush1.bf16.msra.mxu0 %v1443_v0  ;;  %v529_v1 = vld [vmem:[#allocation2 + $0x48] sm:$0xf]  ;;  %v528_v2 = vld [vmem:[#allocation2 + $0x40] sm:$0xf] }
  0xd4   : > { %1422 = vmatprep.subr.msk.mxu0 %vm539_vm8, %v529_v1 }
  0xd7   : > { %1423 = vmatpush1.msk.msra.mxu0 %vm539_vm8, %v528_v2 }
  0xd8   : > { %1424 = vmatmul.mubr.msk.f32.vlgmr.msra.gmra.mrb[0].mxu0 %vm535_vm9, %v314_v3  ;;  %1426 = vmatprep.subr.msk.mxu0 %vm539_vm8, %v1854_v10 }
  0xd9   : > { %1427 = vmatpush1.msk.msra.mxu0 %vm539_vm8, %v1840_v7  ;;  %1300 = vmatprep.mubr.f32.mxu0 %v1699_v33  ;;  %v533_v4 = vpop.permute.xlu0 %532 }
 0x1ab   : > { %v612_v5 = vpop.f32.mrb[0].mxu0 }
 0x1ac   : > { %v2007_v6 = vadd.f32 %v612_v5, %v533_v4  ;;  %v614_v8 = vpop.f32.mrb[1].mxu0 }
 0x1ad   : > { %v2009_v9 = vadd.f32 %v614_v8, %v533_v4 }
 0x1ae   : > { %v618_v13 = vsel %vm617_vm10, %v2007_v6, 0.0  ;;  %v657_v22 = vrot.slane %v2007_v6, 2  ;;  %v703_v29 = vrot.slane %v2007_v6, 4  ;;  %v749_v40 = vrot.slane %v2007_v6, 6 }
 0x1af   : > { %v619_v10 = vsel %vm617_vm10, %v2009_v9, 0.0  ;;  %v658_v7 = vrot.slane %v2009_v9, 2  ;;  %v704_v30 = vrot.slane %v2009_v9, 4  ;;  %v750_v41 = vrot.slane %v2009_v9, 6 }
 0x1b0   : > { %v620_v25 = vadd.f32 %v619_v10, %v618_v13  ;;  %v661_v33 = vsel %vm617_vm10, %v657_v22, 0.0  ;;  %v707_v38 = vsel %vm617_vm10, %v703_v29, 0.0  ;;  %v753_v43 = vsel %vm617_vm10, %v749_v40, 0.0 }
 0x1b1   : > { %v662_v26 = vsel %vm617_vm10, %v658_v7, 0.0  ;;  %v708_v39 = vsel %vm617_vm10, %v704_v30, 0.0  ;;  %v754_v44 = vsel %vm617_vm10, %v750_v41, 0.0 }
 0x1b2   : > { %621 = vadd.xlane.f32.xlu1 %v620_v25  ;;  %v663_v37 = vadd.f32 %v662_v26, %v661_v33  ;;  %v709_v42 = vadd.f32 %v708_v39, %v707_v38  ;;  %v755_v45 = vadd.f32 %v754_v44, %v753_v43 }
 0x1b6   : > { %664 = vadd.xlane.f32.xlu1 %v663_v37 }
 0x1ba   : > { %710 = vadd.xlane.f32.xlu1 %v709_v42 }
 0x1be   : > { %756 = vadd.xlane.f32.xlu1 %v755_v45 }
 0x23f   : > { %v622_v46 = vpop.xlane.xlu1 %621 }
 0x240   : > { %v623_v47 = vrot.slane %v622_v46, 4 }
 0x242   : > { %v624_v48 = vadd.f32 %v623_v47, %v622_v46 }
 0x243   : > { %v665_v0 = vpop.xlane.xlu1 %664 }
 0x244   : > { %v625_v49 = vrot.slane %v624_v48, 2  ;;  %v666_v1 = vrot.slane %v665_v0, 4 }
 0x246   : > { %v626_v50 = vadd.f32 %v625_v49, %v624_v48  ;;  %v667_v2 = vadd.f32 %v666_v1, %v665_v0 }
 0x247   : > { %v711_v46 = vpop.xlane.xlu1 %710 }
 0x248   : > { %v627_v53 = vrot.slane %v626_v50, 1  ;;  %v668_v3 = vrot.slane %v667_v2, 2  ;;  %v712_v47 = vrot.slane %v711_v46, 4 }
 0x24a   : > { %v628_v54 = vadd.f32 %v627_v53, %v626_v50  ;;  %v669_v13 = vadd.f32 %v668_v3, %v667_v2  ;;  %v713_v48 = vadd.f32 %v712_v47, %v711_v46 }
 0x24c   : > { %1461 = vpush %v628_v54  ;;  %v670_v7 = vrot.slane %v669_v13, 1  ;;  %v714_v49 = vrot.slane %v713_v48, 2 }
 0x24e   : > { %v671_v26 = vadd.f32 %v670_v7, %v669_v13 }
 0x27d   : > { %s1462_s20 = spop %1461 }
 0x27e   : > { %v630_v55 = vstv %s1462_s20  ;;  %s1435_s20 = sshll.u32 %s1833_s14, 4 }
 0x27f   : > { %v632_v56 = vmul.f32 0.001953125, %v630_v55  ;;  %v715_v55 = vadd.f32 %v714_v49, %v713_v48  ;;  %v1701_v48 = vmov 1   ;;  %v1702_v49 = vmov 2  }
 0x280   : > { %1560 = vset.pattern.permute.xlu1 %v1701_v48  ;;  %1561 = vset.pattern.permute.xlu0 %v1702_v49 }
 0x281   : > { %v2028_v57 = vsub.f32 %v2007_v6, %v632_v56  ;;  %v2031_v58 = vsub.f32 %v2009_v9, %v632_v56  ;;  %803 = vperm.xlu1 %1560, %v1924_v34  }
 0x283   : > { %v635_v59 = vmul.f32 %v2028_v57, %v2028_v57  ;;  %v636_v60 = vmul.f32 %v2031_v58, %v2031_v58 }
 0x285   : > { %v637_v61 = vsel %vm617_vm10, %v635_v59, 0.0  ;;  %v638_v62 = vsel %vm617_vm10, %v636_v60, 0.0  ;;  %v716_v60 = vrot.slane %v715_v55, 1  ;;  %1562 = vset.pattern.permute.xlu1 %v1700_v35 }
 0x286   : > { %v639_v63 = vadd.f32 %v638_v62, %v637_v61 }
 0x288   : > { %640 = vadd.xlane.f32.xlu0 %v639_v63  ;;  %v717_v63 = vadd.f32 %v716_v60, %v715_v55 }
 0x315   : > { %v641_v4 = vpop.xlane.xlu0 %640 }
 0x316   : > { %v642_v5 = vrot.slane %v641_v4, 4 }
 0x318   : > { %v643_v8 = vadd.f32 %v642_v5, %v641_v4 }
 0x31a   : > { %v644_v22 = vrot.slane %v643_v8, 2 }
 0x31c   : > { %v645_v10 = vadd.f32 %v644_v22, %v643_v8 }
 0x31e   : > { %v646_v25 = vrot.slane %v645_v10, 1 }
 0x320   : > { %v647_v33 = vadd.f32 %v646_v25, %v645_v10 }
 0x322   : > { %1463 = vpush %v647_v33 }
 0x323   : > { %1465 = vpush %v671_v26 }
 0x353   : > { %s2039_s21 = spop %1463 }
 0x354   : > { %s1466_s17 = spop %1465  ;;  %v649_v0 = vstv %s2039_s21 }
 0x355   : > { %v673_v29 = vstv %s1466_s17  ;;  %v650_v1 = vmul.f32 0.001953125, %v649_v0 }
 0x356   : > { %v674_v30 = vmul.f32 0.001953125, %v673_v29 }
 0x357   : > { %v651_v2 = vadd.f32 1e-05, %v650_v1 }
 0x358   : > { %v675_v37 = vsub.f32 %v2007_v6, %v674_v30  ;;  %v676_v38 = vsub.f32 %v2009_v9, %v674_v30 }
 0x359   : > { %1569 = vrsqrt.f32 %v651_v2 }
 0x35a   : > { %v677_v39 = vmul.f32 %v675_v37, %v675_v37  ;;  %v678_v40 = vmul.f32 %v676_v38, %v676_v38 }
 0x35c   : > { %v681_v41 = vrot.slane %v677_v39, 2  ;;  %v682_v42 = vrot.slane %v678_v40, 2 }
 0x35e   : > { %v685_v43 = vsel %vm617_vm10, %v681_v41, 0.0  ;;  %v686_v44 = vsel %vm617_vm10, %v682_v42, 0.0 }
 0x35f   : > { %v687_v45 = vadd.f32 %v686_v44, %v685_v43 }
 0x361   : > { %688 = vadd.xlane.f32.xlu0 %v687_v45 }
 0x363   : > { %v1570_v40 = vpop.eup %1569 }
 0x364   : > { %v653_v42 = vmul.f32 %v1570_v40, %v2028_v57  ;;  %v654_v43 = vmul.f32 %v1570_v40, %v2031_v58 }
 0x3ee   : > { %v689_v50 = vpop.xlane.xlu0 %688 }
 0x3ef   : > { %v690_v53 = vrot.slane %v689_v50, 4 }
 0x3f1   : > { %v691_v54 = vadd.f32 %v690_v53, %v689_v50 }
 0x3f3   : > { %v692_v56 = vrot.slane %v691_v54, 2 }
 0x3f5   : > { %v693_v59 = vadd.f32 %v692_v56, %v691_v54 }
 0x3f7   : > { %v694_v61 = vrot.slane %v693_v59, 1 }
 0x3f9   : > { %v695_v62 = vadd.f32 %v694_v61, %v693_v59 }
 0x3fb   : > { %1467 = vpush %v695_v62 }
 0x3fc   : > { %1469 = vpush %v717_v63 }
 0x42c   : > { %s1468_s18 = spop %1467 }
 0x42d   : > { %v697_v3 = vstv %s1468_s18  ;;  %s1470_s19 = spop %1469  ;;  %s309_s18 = scalar_lea.vmem %s2273_s1, %s1435_s20 }
 0x42e   : > { %v698_v4 = vmul.f32 0.001953125, %v697_v3  ;;  %v719_v5 = vstv %s1470_s19  ;;  %v319_v57 = vld [vmem:[%s309_s18] sm:$0xff]  ;;  %v320_v58 = vld [vmem:[%s309_s18 + $0x8] sm:$0xff] }
 0x42f   : > { %v720_v8 = vmul.f32 0.001953125, %v719_v5  ;;  %v814_v50 = vadd.f32 1.0, %v319_v57 }
 0x430   : > { %v699_v13 = vadd.f32 1e-05, %v698_v4 }
 0x431   : > { %v2047_v22 = vsub.f32 %v2007_v6, %v720_v8  ;;  %v2050_v10 = vsub.f32 %v2009_v9, %v720_v8  ;;  %817 = vperm.xlu1 %1562, %v814_v50  }
 0x432   : > { %1571 = vrsqrt.f32 %v699_v13 }
 0x433   : > { %v723_v7 = vmul.f32 %v2047_v22, %v2047_v22  ;;  %v724_v25 = vmul.f32 %v2050_v10, %v2050_v10 }
 0x435   : > { %v727_v33 = vrot.slane %v723_v7, 4  ;;  %v728_v26 = vrot.slane %v724_v25, 4  ;;  %824 = vperm.xlu1 %1562, %v320_v58  }
 0x437   : > { %v731_v29 = vsel %vm617_vm10, %v727_v33, 0.0  ;;  %v732_v30 = vsel %vm617_vm10, %v728_v26, 0.0 }
 0x438   : > { %v733_v39 = vadd.f32 %v732_v30, %v731_v29 }
 0x43a   : > { %734 = vadd.xlane.f32.xlu0 %v733_v39 }
 0x43c   : > { %v1572_v41 = vpop.eup %1571 }
 0x43d   : > { %v701_v44 = vmul.f32 %v1572_v41, %v675_v37  ;;  %v702_v45 = vmul.f32 %v1572_v41, %v676_v38  ;;  %v757_v37 = vpop.xlane.xlu1 %756 }
 0x43e   : > { %v758_v38 = vrot.slane %v757_v37, 4 }
 0x43f   : > { %v795_v46 = vsel %vm617_vm10, %v653_v42, %v701_v44  ;;  %v796_v47 = vsel %vm617_vm10, %v654_v43, %v702_v45 }
 0x440   : > { %v759_v53 = vadd.f32 %v758_v38, %v757_v37 }
 0x442   : > { %v760_v54 = vrot.slane %v759_v53, 2 }
 0x444   : > { %v761_v60 = vadd.f32 %v760_v54, %v759_v53 }
 0x446   : > { %v762_v63 = vrot.slane %v761_v60, 1 }
 0x448   : > { %v763_v2 = vadd.f32 %v762_v63, %v761_v60 }
 0x4c7   : > { %v735_v55 = vpop.xlane.xlu0 %734 }
 0x4c8   : > { %v736_v56 = vrot.slane %v735_v55, 4 }
 0x4ca   : > { %v737_v59 = vadd.f32 %v736_v56, %v735_v55 }
 0x4cc   : > { %v738_v61 = vrot.slane %v737_v59, 2 }
 0x4ce   : > { %v739_v62 = vadd.f32 %v738_v61, %v737_v59 }
 0x4d0   : > { %v740_v0 = vrot.slane %v739_v62, 1 }
 0x4d2   : > { %v741_v1 = vadd.f32 %v740_v0, %v739_v62 }
 0x4d4   : > { %1471 = vpush %v741_v1 }
 0x4d5   : > { %1473 = vpush %v763_v2 }
 0x505   : > { %s1472_s14 = spop %1471 }
 0x506   : > { %v743_v35 = vstv %s1472_s14  ;;  %s1474_s19 = spop %1473 }
 0x507   : > { %v744_v3 = vmul.f32 0.001953125, %v743_v35  ;;  %v765_v4 = vstv %s1474_s19  ;;  %s297_s19 = sand.u32 1, %s1680_s25  }
 0x508   : > { %v766_v5 = vmul.f32 0.001953125, %v765_v4 }
 0x509   : > { %v745_v8 = vadd.f32 1e-05, %v744_v3 }
 0x50a   : > { %v767_v13 = vsub.f32 %v2007_v6, %v766_v5  ;;  %v768_v7 = vsub.f32 %v2009_v9, %v766_v5 }
 0x50b   : > { %1573 = vrsqrt.f32 %v745_v8 }
 0x50c   : > { %v769_v25 = vmul.f32 %v767_v13, %v767_v13  ;;  %v770_v33 = vmul.f32 %v768_v7, %v768_v7 }
 0x50e   : > { %v773_v26 = vrot.slane %v769_v25, 6  ;;  %v774_v29 = vrot.slane %v770_v33, 6 }
 0x510   : > { %v777_v30 = vsel %vm617_vm10, %v773_v26, 0.0  ;;  %v778_v39 = vsel %vm617_vm10, %v774_v29, 0.0 }
 0x511   : > { %v779_v40 = vadd.f32 %v778_v39, %v777_v30 }
 0x513   : > { %780 = vadd.xlane.f32.xlu0 %v779_v40 }
 0x515   : > { %v1574_v41 = vpop.eup %1573 }
 0x516   : > { %v747_v42 = vmul.f32 %v1574_v41, %v2047_v22  ;;  %v748_v43 = vmul.f32 %v1574_v41, %v2050_v10  ;;  %v804_v10 = vpop.permute.xlu1 %803 }
 0x518   : > { %v797_v6 = vsel %vm539_vm8, %v795_v46, %v747_v42  ;;  %v798_v9 = vsel %vm539_vm8, %v796_v47, %v748_v43 }
 0x51a   : > { %v818_v56 = vpop.permute.xlu1 %817 }
 0x51e   : > { %v825_v2 = vpop.permute.xlu1 %824 }
 0x529   : > { %809 = vperm.xlu0 %1561, %v1924_v34  }
 0x5a0   : > { %v781_v44 = vpop.xlane.xlu0 %780 }
 0x5a1   : > { %v782_v45 = vrot.slane %v781_v44, 4 }
 0x5a3   : > { %v783_v48 = vadd.f32 %v782_v45, %v781_v44 }
 0x5a5   : > { %v784_v49 = vrot.slane %v783_v48, 2 }
 0x5a7   : > { %v785_v57 = vadd.f32 %v784_v49, %v783_v48 }
 0x5a8   : > { %v810_v59 = vpop.permute.xlu0 %809 }
 0x5a9   : > { %v786_v50 = vrot.slane %v785_v57, 1 }
 0x5ab   : > { %v787_v58 = vadd.f32 %v786_v50, %v785_v57 }
 0x5ad   : > { %1475 = vpush %v787_v58 }
 0x5de   : > { %s1476_s20 = spop %1475 }
 0x5df   : > { %v789_v37 = vstv %s1476_s20  ;;  %s1415_s20 = sshll.u32 %s297_s19, 4 }
 0x5e0   : > { %v790_v38 = vmul.f32 0.001953125, %v789_v37 }
 0x5e2   : > { %v791_v22 = vadd.f32 1e-05, %v790_v38 }
 0x5e4   : > { %1575 = vrsqrt.f32 %v791_v22 }
 0x5ee   : > { %v1576_v53 = vpop.eup %1575 }
 0x5ef   : > { %v793_v46 = vmul.f32 %v1576_v53, %v767_v13  ;;  %v794_v47 = vmul.f32 %v1576_v53, %v768_v7 }
 0x5f1   : > { %v800_v54 = vsel %vm799_vm11, %v797_v6, %v793_v46  ;;  %v801_v55 = vsel %vm799_vm11, %v798_v9, %v794_v47 }
 0x5f2   : > { %v806_v60 = vmul.f32 %v804_v10, %v800_v54  ;;  %v807_v61 = vmul.f32 %v804_v10, %v801_v55 }
 0x5f4   : > { %v812_v62 = vadd.f32 %v810_v59, %v806_v60  ;;  %v813_v63 = vadd.f32 %v810_v59, %v807_v61 }
 0x5f6   : > { %v820_v0 = vmul.f32 %v818_v56, %v812_v62  ;;  %v821_v1 = vmul.f32 %v818_v56, %v813_v63 }
 0x5f8   : > { %v827_v35 = vadd.f32 %v825_v2, %v820_v0  ;;  %v828_v3 = vadd.f32 %v825_v2, %v821_v1 }
 0x5fa   : > { %v829_v4 = vmul.f32 0.5, %v827_v35  ;;  %v830_v5 = vmul.f32 0.5, %v828_v3 }
 0x5fc   : > { %1577 = vtanh.f32 %v829_v4 }
 0x5fd   : > { %1579 = vtanh.f32 %v830_v5 }
 0x606   : > { %v1578_v8 = vpop.eup %1577 }
 0x607   : > { %v1580_v13 = vpop.eup %1579  ;;  %v833_v7 = vmul.f32 0.5, %v1578_v8 }
 0x608   : > { %v834_v25 = vmul.f32 0.5, %v1580_v13 }
 0x609   : > { %v835_v33 = vadd.f32 0.5, %v833_v7 }
 0x60a   : > { %v836_v26 = vadd.f32 0.5, %v834_v25 }
 0x60b   : > { %v837_v29 = vmul.f32 %v835_v33, %v827_v35 }
 0x60c   : > { %v838_v30 = vmul.f32 %v836_v26, %v828_v3 }
 0x60d   : > { %v2080_v39 = vmul.f32 %v837_v29, %v1860_v14  ;;  %869 = vrot.lane.b32.xlu0 %v837_v29, %s1691_s22  ;;  %839 = vrot.lane.b32.xlu1 %v837_v29, %s1693_s29  ;;  %v1703_v14 = vmov 3  }
 0x60e   : > { %v2085_v40 = vmul.f32 %v838_v30, %v1862_v15  ;;  %1563 = vset.pattern.permute.xlu0 %v1703_v14 }
 0x60f   : > { %881 = vst [vmem:[#allocation2 + $0x40] sm:$0xff] %v2080_v39 }
 0x610   : > { %882 = vst [vmem:[#allocation2 + $0x48] sm:$0xff] %v2085_v40 }
 0x611   : > { %883 = vrot.lane.b32.xlu0 %v837_v29, %s1695_s9  ;;  %841 = vrot.lane.b32.xlu1 %v838_v30, %s1693_s29 }
 0x615   : > { %893 = vrot.lane.b32.xlu0 %v837_v29, %s1697_s15  ;;  %849 = vrot.lane.b32.xlu1 %v837_v29, %s1692_s23 }
 0x619   : > { %903 = vrot.lane.b32.xlu0 %v837_v29, %s1696_s16  ;;  %851 = vrot.lane.b32.xlu1 %v838_v30, %s1692_s23 }
 0x61d   : > { %913 = vrot.lane.b32.xlu0 %v837_v29, %s1698_s13  ;;  %859 = vrot.lane.b32.xlu1 %v837_v29, %s1694_s8 }
 0x621   : > { %861 = vrot.lane.b32.xlu1 %v838_v30, %s1694_s8  ;;  %942 = vperm.xlu0 %1563, %v1924_v34  }
 0x625   : > { %871 = vrot.lane.b32.xlu1 %v838_v30, %s1691_s22 }
 0x629   : > { %885 = vrot.lane.b32.xlu1 %v838_v30, %s1695_s9 }
 0x62d   : > { %895 = vrot.lane.b32.xlu1 %v838_v30, %s1697_s15  ;;  %s1312_s15 = scalar_lea.sflag [#allocation5], %s297_s19 }
 0x631   : > { %905 = vrot.lane.b32.xlu1 %v838_v30, %s1696_s16 }
 0x635   : > { %915 = vrot.lane.b32.xlu1 %v838_v30, %s1698_s13 }
 0x67f   : > { %v840_v15 = vpop.permute.xlu1 %839  ;;  %v870_v50 = vpop.permute.xlu0 %869 }
 0x683   : > { %v842_v41 = vpop.permute.xlu1 %841  ;;  %v884_v10 = vpop.permute.xlu0 %883 }
 0x684   : > { %v843_v42 = vsel %vm330_vm1, %v840_v15, %v842_v41  ;;  %v844_v43 = vsel %vm330_vm1, %v842_v41, %v840_v15 }
 0x685   : > { %v845_v6 = vmul.f32 %v844_v43, %v1864_v16  ;;  %v846_v9 = vmul.f32 %v843_v42, %v1866_v17 }
 0x687   : > { %847 = vst [vmem:[#allocation2] sm:$0xff] %v845_v6  ;;  %848 = vst [vmem:[#allocation2 + $0x8] sm:$0xff] %v846_v9  ;;  %v850_v44 = vpop.permute.xlu1 %849  ;;  %v894_v56 = vpop.permute.xlu0 %893 }
 0x68b   : > { %v852_v45 = vpop.permute.xlu1 %851  ;;  %v904_v35 = vpop.permute.xlu0 %903 }
 0x68c   : > { %v853_v34 = vsel %vm349_vm2, %v850_v44, %v852_v45  ;;  %v854_v48 = vsel %vm349_vm2, %v852_v45, %v850_v44 }
 0x68d   : > { %v855_v49 = vmul.f32 %v854_v48, %v1868_v18  ;;  %v856_v57 = vmul.f32 %v853_v34, %v1870_v19 }
 0x68f   : > { %857 = vst [vmem:[#allocation2 + $0x10] sm:$0xff] %v855_v49  ;;  %858 = vst [vmem:[#allocation2 + $0x18] sm:$0xff] %v856_v57  ;;  %v860_v16 = vpop.permute.xlu1 %859  ;;  %v1445_v58 = vpack.c.bf16 %v856_v57, %v846_v9  ;;  %v1447_v17 = vpack.c.bf16 %v855_v49, %v845_v6  ;;  %v914_v7 = vpop.permute.xlu0 %913 }
 0x691   : > { %1446 = vmatprep.subr.bf16.mxu1 %v1445_v58 }
 0x692   : > { %1448 = vmatpush1.bf16.msra.mxu1 %v1447_v17 }
 0x693   : > { %v862_v37 = vpop.permute.xlu1 %861 }
 0x694   : > { %v863_v38 = vsel %vm374_vm3, %v860_v16, %v862_v37  ;;  %v864_v22 = vsel %vm374_vm3, %v862_v37, %v860_v16 }
 0x695   : > { %v865_v18 = vmul.f32 %v864_v22, %v1872_v20  ;;  %v866_v19 = vmul.f32 %v863_v38, %v1874_v21 }
 0x697   : > { %867 = vst [vmem:[#allocation2 + $0x20] sm:$0xff] %v865_v18  ;;  %868 = vst [vmem:[#allocation2 + $0x28] sm:$0xff] %v866_v19  ;;  %v872_v53 = vpop.permute.xlu1 %871 }
 0x698   : > { %v873_v46 = vsel %vm393_vm0, %v870_v50, %v872_v53  ;;  %v874_v47 = vsel %vm393_vm0, %v872_v53, %v870_v50 }
 0x699   : > { %v875_v54 = vmul.f32 %v874_v47, %v1856_v11  ;;  %v876_v55 = vmul.f32 %v873_v46, %v1858_v12 }
 0x69b   : > { %877 = vst [vmem:[#allocation2 + $0x30] sm:$0xff] %v875_v54  ;;  %878 = vst [vmem:[#allocation2 + $0x38] sm:$0xff] %v876_v55  ;;  %v886_v59 = vpop.permute.xlu1 %885  ;;  %v1449_v20 = vpack.c.bf16 %v876_v55, %v866_v19  ;;  %v1451_v60 = vpack.c.bf16 %v875_v54, %v865_v18 }
 0x69c   : > { %v887_v21 = vsel %vm436_vm4, %v884_v10, %v886_v59  ;;  %v888_v61 = vsel %vm436_vm4, %v886_v59, %v884_v10 }
 0x69d   : > { %v889_v62 = vmul.f32 %v887_v21, %v1878_v23  ;;  %v890_v63 = vmul.f32 %v888_v61, %v1880_v24  ;;  %1450 = vmatprep.subr.bf16.mxu1 %v1449_v20 }
 0x69e   : > { %1452 = vmatpush1.bf16.msra.mxu1 %v1451_v60 }
 0x69f   : > { %v896_v11 = vpop.permute.xlu1 %895  ;;  %v1453_v12 = vpack.c.bf16 %v890_v63, %v2085_v40  ;;  %v1455_v0 = vpack.c.bf16 %v889_v62, %v2080_v39 }
 0x6a0   : > { %v897_v1 = vsel %vm461_vm6, %v894_v56, %v896_v11  ;;  %v898_v2 = vsel %vm461_vm6, %v896_v11, %v894_v56 }
 0x6a1   : > { %v899_v3 = vmul.f32 %v897_v1, %v1895_v31  ;;  %v900_v23 = vmul.f32 %v898_v2, %v1897_v32  ;;  %1454 = vmatprep.subr.bf16.mxu1 %v1453_v12 }
 0x6a2   : > { %1456 = vmatpush1.bf16.msra.mxu1 %v1455_v0 }
 0x6a3   : > { %v906_v24 = vpop.permute.xlu1 %905 }
 0x6a4   : > { %v907_v4 = vsel %vm480_vm5, %v904_v35, %v906_v24  ;;  %v908_v5 = vsel %vm480_vm5, %v906_v24, %v904_v35 }
 0x6a5   : > { %v909_v8 = vmul.f32 %v907_v4, %v1887_v27  ;;  %v910_v13 = vmul.f32 %v908_v5, %v1889_v28  ;;  %v315_v27 = vld [vmem:[#allocation3] sm:$0xff]  ;;  %v943_v28 = vpop.permute.xlu0 %942 }
 0x6a7   : > { %v916_v25 = vpop.permute.xlu1 %915  ;;  %v1457_v33 = vpack.c.bf16 %v910_v13, %v900_v23  ;;  %v1459_v26 = vpack.c.bf16 %v909_v8, %v899_v3 }
 0x6a8   : > { %v917_v31 = vsel %vm505_vm7, %v914_v7, %v916_v25  ;;  %v918_v32 = vsel %vm505_vm7, %v916_v25, %v914_v7 }
 0x6a9   : > { %v919_v29 = vmul.f32 %v1984_v51, %v917_v31  ;;  %v920_v30 = vmul.f32 %v1989_v52, %v918_v32  ;;  %1458 = vmatprep.subr.bf16.mxu1 %v1457_v33 }
 0x6aa   : > { %1460 = vmatpush1.bf16.msra.mxu1 %v1459_v26 }
 0x6ab   : > { %965 = vmatprep.subr.mxu1 %v920_v30 }
 0x6ae   : > { %966 = vmatpush1.msra.mxu1 %v919_v29 }
 0x6af   : > { %1425 = vmatmul.mubr.msk.f32.vlgmr.msra.gmra.mrb[0].mxu1 %vm945_vm12, %v315_v27 }
 0x782   : > { %v1015_v39 = vpop.f32.mrb[0].mxu1 }
 0x783   : > { %v2154_v40 = vadd.f32 %v1015_v39, %v943_v28  ;;  %v1017_v14 = vpop.f32.mrb[1].mxu1 }
 0x784   : > { %v2156_v15 = vadd.f32 %v1017_v14, %v943_v28 }
 0x785   : > { %v1020_v36 = vsel %vm617_vm10, %v2154_v40, 0.0  ;;  %v1058_v51 = vrot.slane %v2154_v40, 2  ;;  %v1104_v9 = vrot.slane %v2154_v40, 4  ;;  %v1150_v49 = vrot.slane %v2154_v40, 6 }
 0x786   : > { %v1021_v52 = vsel %vm617_vm10, %v2156_v15, 0.0  ;;  %v1059_v41 = vrot.slane %v2156_v15, 2  ;;  %v1105_v44 = vrot.slane %v2156_v15, 4  ;;  %v1151_v57 = vrot.slane %v2156_v15, 6 }
 0x787   : > { %v1022_v42 = vadd.f32 %v1021_v52, %v1020_v36  ;;  %v1062_v43 = vsel %vm617_vm10, %v1058_v51, 0.0  ;;  %v1108_v34 = vsel %vm617_vm10, %v1104_v9, 0.0  ;;  %v1154_v16 = vsel %vm617_vm10, %v1150_v49, 0.0 }
 0x788   : > { %v1063_v6 = vsel %vm617_vm10, %v1059_v41, 0.0  ;;  %v1109_v48 = vsel %vm617_vm10, %v1105_v44, 0.0  ;;  %v1155_v58 = vsel %vm617_vm10, %v1151_v57, 0.0 }
 0x789   : > { %1023 = vadd.xlane.f32.xlu1 %v1022_v42  ;;  %v1064_v45 = vadd.f32 %v1063_v6, %v1062_v43  ;;  %v1110_v50 = vadd.f32 %v1109_v48, %v1108_v34  ;;  %v1156_v17 = vadd.f32 %v1155_v58, %v1154_v16 }
 0x78d   : > { %1065 = vadd.xlane.f32.xlu1 %v1064_v45 }
 0x791   : > { %1111 = vadd.xlane.f32.xlu1 %v1110_v50 }
 0x795   : > { %1157 = vadd.xlane.f32.xlu1 %v1156_v17 }
 0x816   : > { %v1024_v37 = vpop.xlane.xlu1 %1023 }
 0x817   : > { %v1025_v38 = vrot.slane %v1024_v37, 4 }
 0x819   : > { %v1026_v22 = vadd.f32 %v1025_v38, %v1024_v37 }
 0x81a   : > { %v1066_v61 = vpop.xlane.xlu1 %1065 }
 0x81b   : > { %v1027_v10 = vrot.slane %v1026_v22, 2  ;;  %v1067_v62 = vrot.slane %v1066_v61, 4 }
 0x81d   : > { %v1028_v18 = vadd.f32 %v1027_v10, %v1026_v22  ;;  %v1068_v63 = vadd.f32 %v1067_v62, %v1066_v61 }
 0x81e   : > { %v1112_v28 = vpop.xlane.xlu1 %1111 }
 0x81f   : > { %v1029_v19 = vrot.slane %v1028_v18, 1  ;;  %v1069_v11 = vrot.slane %v1068_v63, 2  ;;  %v1113_v39 = vrot.slane %v1112_v28, 4 }
 0x821   : > { %v1030_v53 = vadd.f32 %v1029_v19, %v1028_v18  ;;  %v1070_v2 = vadd.f32 %v1069_v11, %v1068_v63  ;;  %v1114_v14 = vadd.f32 %v1113_v39, %v1112_v28 }
 0x823   : > { %1477 = vpush %v1030_v53  ;;  %v1071_v23 = vrot.slane %v1070_v2, 1  ;;  %v1115_v36 = vrot.slane %v1114_v14, 2 }
 0x825   : > { %v1072_v5 = vadd.f32 %v1071_v23, %v1070_v2  ;;  %v1116_v42 = vadd.f32 %v1115_v36, %v1114_v14  ;;  %v1158_v2 = vpop.xlane.xlu1 %1157 }
 0x827   : > { %v1117_v9 = vrot.slane %v1116_v42, 1 }
 0x829   : > { %v1118_v34 = vadd.f32 %v1117_v9, %v1116_v42 }
 0x854   : > { %s1478_s22 = spop %1477 }
 0x855   : > { %v1032_v46 = vstv %s1478_s22  ;;  %s1436_s22 = sshll.u32 %s1769_s28, 8  ;;  %s1707_s28 = smov [#allocation6]  }
 0x856   : > { %v1033_v47 = vmul.f32 0.001953125, %v1032_v46  ;;  %s2230_s16 = scalar_lea.hbm %s2279_s7, %s1436_s22  ;;  %s1626_s21 = sshll.u32 %s1707_s28, 4  ;;  %s1627_s21 = int_to_ptr.vmem [resolvable:$false] %s1626_s21 }
 0x858   : > { %v2175_v54 = vsub.f32 %v2154_v40, %v1033_v47  ;;  %v2178_v55 = vsub.f32 %v2156_v15, %v1033_v47 }
 0x85a   : > { %v1036_v56 = vmul.f32 %v2175_v54, %v2175_v54  ;;  %v1037_v59 = vmul.f32 %v2178_v55, %v2178_v55 }
 0x85c   : > { %v1038_v20 = vsel %vm617_vm10, %v1036_v56, 0.0  ;;  %v1039_v60 = vsel %vm617_vm10, %v1037_v59, 0.0 }
 0x85d   : > { %v1040_v21 = vadd.f32 %v1039_v60, %v1038_v20 }
 0x85f   : > { %1041 = vadd.xlane.f32.xlu0 %v1040_v21 }
 0x8ec   : > { %v1042_v12 = vpop.xlane.xlu0 %1041 }
 0x8ed   : > { %v1043_v0 = vrot.slane %v1042_v12, 4 }
 0x8ef   : > { %v1044_v1 = vadd.f32 %v1043_v0, %v1042_v12  ;;  %v316_v12 = vld [vmem:[%s2277_s5] sm:$0xff]  ;;  %v1704_v0 = vmov 4  }
 0x8f0   : > { %1428 = vmatmul.mubr.msk.f32.vlgmr.msra.gmra.mrb[2].mxu0 %vm1228_vm13, %v316_v12  ;;  %1564 = vset.pattern.permute.xlu1 %v1704_v0 }
 0x8f1   : > { %v1045_v35 = vrot.slane %v1044_v1, 2 }
 0x8f3   : > { %v1046_v3 = vadd.f32 %v1045_v35, %v1044_v1  ;;  %v1706_v1 = vmov 6   ;;  %v1159_v35 = vrot.slane %v1158_v2, 4 }
 0x8f5   : > { %v1047_v24 = vrot.slane %v1046_v3, 1 }
 0x8f7   : > { %v1048_v4 = vadd.f32 %v1047_v24, %v1046_v3  ;;  %v1160_v3 = vadd.f32 %v1159_v35, %v1158_v2 }
 0x8f9   : > { %1479 = vpush %v1048_v4  ;;  %v1161_v23 = vrot.slane %v1160_v3, 2 }
 0x8fa   : > { %1481 = vpush %v1072_v5 }
 0x92a   : > { %s2186_s23 = spop %1479 }
 0x92b   : > { %s1482_s29 = spop %1481  ;;  %v1050_v48 = vstv %s2186_s23  ;;  %s299_s23 = scalar_lea.vmem [#allocation6], %s1415_s20 }
 0x92c   : > { %v1074_v8 = vstv %s1482_s29  ;;  %v1051_v49 = vmul.f32 0.001953125, %v1050_v48  ;;  %s1326_s29 = sshll.u32 %s299_s23, 4  ;;  %s2232_s29 = int_to_ptr.vmem [resolvable:$true] %s1326_s29 }
 0x92d   : > { %v1075_v13 = vmul.f32 0.001953125, %v1074_v8  ;;  %v1162_v8 = vadd.f32 %v1161_v23, %v1160_v3  ;;  %s1622_s13 = scalar_lea.vmem %s2232_s29, 256  ;;  %p1629_p2 = scmp.lt.s32.totalorder %s2232_s29, %s1627_s21 }
 0x92e   : > { %v1052_v57 = vadd.f32 1e-05, %v1051_v49  ;;  %p1623_p5 = scmp.ne.s32.totalorder %s2232_s29, %s1622_s13 }
 0x92f   : > { %v1076_v7 = vsub.f32 %v2154_v40, %v1075_v13  ;;  %v1077_v25 = vsub.f32 %v2156_v15, %v1075_v13 }
 0x930   : > { %1581 = vrsqrt.f32 %v1052_v57  ;;  %p1624_p10 = pnand %p1623_p5, %p2290_p9 }
 0x931   : > { %v1078_v33 = vmul.f32 %v1076_v7, %v1076_v7  ;;  %v1079_v26 = vmul.f32 %v1077_v25, %v1077_v25 }
 0x932   : > { %p1625_p12 = pneg %p1624_p10 }
 0x933   : > { %v1082_v31 = vrot.slane %v1078_v33, 2  ;;  %v1083_v32 = vrot.slane %v1079_v26, 2 }
 0x935   : > { %v1086_v29 = vsel %vm617_vm10, %v1082_v31, 0.0  ;;  %v1087_v30 = vsel %vm617_vm10, %v1083_v32, 0.0 }
 0x936   : > { %v1088_v27 = vadd.f32 %v1087_v30, %v1086_v29 }
 0x938   : > { %1089 = vadd.xlane.f32.xlu0 %v1088_v27 }
 0x93a   : > { %v1582_v59 = vpop.eup %1581 }
 0x93b   : > { %v1054_v60 = vmul.f32 %v1582_v59, %v2175_v54  ;;  %v1055_v21 = vmul.f32 %v1582_v59, %v2178_v55  ;;  %v1593_v54 = vld [vmem:[%s2278_s6] sm:$0xff]  ;;  %v1705_v55 = vmov 5  }
 0x93c   : > { %1203 = vperm.xlu1 %1564, %v1593_v54   ;;  %1565 = vset.pattern.permute.xlu0 %v1705_v55 }
 0x940   : > { %1566 = vset.pattern.permute.xlu1 %v1706_v1 }
 0x941   : > { %1225 = vperm.xlu1 %1566, %v1593_v54  }
 0x9c5   : > { %v1090_v51 = vpop.xlane.xlu0 %1089 }
 0x9c6   : > { %v1091_v52 = vrot.slane %v1090_v51, 4 }
 0x9c8   : > { %v1092_v41 = vadd.f32 %v1091_v52, %v1090_v51 }
 0x9ca   : > { %v1093_v43 = vrot.slane %v1092_v41, 2 }
 0x9cc   : > { %v1094_v6 = vadd.f32 %v1093_v43, %v1092_v41 }
 0x9ce   : > { %v1095_v44 = vrot.slane %v1094_v6, 1 }
 0x9d0   : > { %v1096_v45 = vadd.f32 %v1095_v44, %v1094_v6 }
 0x9d2   : > { %1483 = vpush %v1096_v45 }
 0x9d3   : > { %1485 = vpush %v1118_v34  ;;  %v1302_v34 = vpop.f32.mrb[2].mxu0 }
 0x9d4   : > { %v1304_v48 = vpop.f32.mrb[3].mxu0 }
 0xa03   : > { %s1484_s8 = spop %1483 }
 0xa04   : > { %v1098_v50 = vstv %s1484_s8  ;;  %s1486_s9 = spop %1485 }
 0xa05   : > { %v1099_v16 = vmul.f32 0.001953125, %v1098_v50  ;;  %v1120_v58 = vstv %s1486_s9 }
 0xa06   : > { %v1121_v17 = vmul.f32 0.001953125, %v1120_v58 }
 0xa07   : > { %v1100_v37 = vadd.f32 1e-05, %v1099_v16 }
 0xa08   : > { %v2194_v38 = vsub.f32 %v2154_v40, %v1121_v17  ;;  %v2197_v22 = vsub.f32 %v2156_v15, %v1121_v17 }
 0xa09   : > { %1583 = vrsqrt.f32 %v1100_v37 }
 0xa0a   : > { %v1124_v10 = vmul.f32 %v2194_v38, %v2194_v38  ;;  %v1125_v18 = vmul.f32 %v2197_v22, %v2197_v22 }
 0xa0c   : > { %v1128_v19 = vrot.slane %v1124_v10, 4  ;;  %v1129_v53 = vrot.slane %v1125_v18, 4 }
 0xa0e   : > { %v1132_v46 = vsel %vm617_vm10, %v1128_v19, 0.0  ;;  %v1133_v47 = vsel %vm617_vm10, %v1129_v53, 0.0 }
 0xa0f   : > { %v1134_v56 = vadd.f32 %v1133_v47, %v1132_v46  ;;  %v1204_v46 = vpop.permute.xlu1 %1203 }
 0xa11   : > { %1135 = vadd.xlane.f32.xlu0 %v1134_v56 }
 0xa13   : > { %v1584_v20 = vpop.eup %1583  ;;  %v1226_v12 = vpop.permute.xlu1 %1225 }
 0xa14   : > { %v1102_v61 = vmul.f32 %v1584_v20, %v1076_v7  ;;  %v1103_v62 = vmul.f32 %v1584_v20, %v1077_v25  ;;  %v1163_v25 = vrot.slane %v1162_v8, 1  ;;  %v1303_v2 = vadd.f32 %v1302_v34, %v1226_v12 }
 0xa15   : > { %v1305_v3 = vadd.f32 %v1304_v48, %v1226_v12 }
 0xa16   : > { %v1196_v63 = vsel %vm617_vm10, %v1054_v60, %v1102_v61  ;;  %v1197_v11 = vsel %vm617_vm10, %v1055_v21, %v1103_v62  ;;  %v1164_v31 = vadd.f32 %v1163_v25, %v1162_v8 }
 0xa9e   : > { %v1136_v24 = vpop.xlane.xlu0 %1135 }
 0xa9f   : > { %v1137_v4 = vrot.slane %v1136_v24, 4 }
 0xaa1   : > { %v1138_v5 = vadd.f32 %v1137_v4, %v1136_v24 }
 0xaa3   : > { %v1139_v13 = vrot.slane %v1138_v5, 2 }
 0xaa5   : > { %v1140_v7 = vadd.f32 %v1139_v13, %v1138_v5 }
 0xaa7   : > { %v1141_v33 = vrot.slane %v1140_v7, 1 }
 0xaa9   : > { %v1142_v26 = vadd.f32 %v1141_v33, %v1140_v7 }
 0xaab   : > { %1487 = vpush %v1142_v26 }
 0xaac   : > { %1489 = vpush %v1164_v31 }
 0xadc   : > { %s1488_s17 = spop %1487 }
 0xadd   : > { %v1144_v32 = vstv %s1488_s17  ;;  %s1490_s18 = spop %1489  ;;  %s1628_s17 = scalar_lea.vmem %s1627_s21, 512 }
 0xade   : > { %v1145_v29 = vmul.f32 0.001953125, %v1144_v32  ;;  %v1166_v30 = vstv %s1490_s18  ;;  %p1630_p3 = scmp.lt.s32.totalorder %s1628_s17, %s1622_s13 }
 0xadf   : > { %v1167_v27 = vmul.f32 0.001953125, %v1166_v30 }
 0xae0   : > { %v1146_v28 = vadd.f32 1e-05, %v1145_v29  ;;  %p1631_p4 = por %p1630_p3, %p1629_p2 }
 0xae1   : > { %v1168_v39 = vsub.f32 %v2154_v40, %v1167_v27  ;;  %v1169_v14 = vsub.f32 %v2156_v15, %v1167_v27 }
 0xae2   : > { %1585 = vrsqrt.f32 %v1146_v28  ;;  %p1632_p7 = pnand %p1631_p4, %p1625_p12 }
 0xae3   : > { %v1170_v36 = vmul.f32 %v1168_v39, %v1168_v39  ;;  %v1171_v51 = vmul.f32 %v1169_v14, %v1169_v14 }
 0xae5   : > { %v1174_v52 = vrot.slane %v1170_v36, 6  ;;  %v1175_v41 = vrot.slane %v1171_v51, 6 }
 0xae7   : > { %v1178_v42 = vsel %vm617_vm10, %v1174_v52, 0.0  ;;  %v1179_v43 = vsel %vm617_vm10, %v1175_v41, 0.0 }
 0xae8   : > { %v1180_v6 = vadd.f32 %v1179_v43, %v1178_v42 }
 0xaea   : > { %1181 = vadd.xlane.f32.xlu0 %v1180_v6 }
 0xaec   : > { %v1586_v9 = vpop.eup %1585 }
 0xaed   : > { %v1148_v44 = vmul.f32 %v1586_v9, %v2194_v38  ;;  %v1149_v45 = vmul.f32 %v1586_v9, %v2197_v22 }
 0xaef   : > { %v1198_v40 = vsel %vm539_vm8, %v1196_v63, %v1148_v44  ;;  %v1199_v15 = vsel %vm539_vm8, %v1197_v11, %v1149_v45 }
 0xb00   : > { %1209 = vperm.xlu0 %1565, %v1593_v54  }
 0xb04   : > { %1567 = vset.pattern.permute.xlu0 %v1706_v1 }
 0xb77   : > { %v1182_v49 = vpop.xlane.xlu0 %1181 }
 0xb78   : > { %v1183_v57 = vrot.slane %v1182_v49, 4 }
 0xb7a   : > { %v1184_v50 = vadd.f32 %v1183_v57, %v1182_v49 }
 0xb7c   : > { %v1185_v16 = vrot.slane %v1184_v50, 2 }
 0xb7e   : > { %v1186_v58 = vadd.f32 %v1185_v16, %v1184_v50 }
 0xb7f   : > { %v1210_v59 = vpop.permute.xlu0 %1209 }
 0xb80   : > { %v1187_v17 = vrot.slane %v1186_v58, 1 }
 0xb82   : > { %v1188_v37 = vadd.f32 %v1187_v17, %v1186_v58 }
 0xb84   : > { %1491 = vpush %v1188_v37 }
 0xbb5   : > { %s1492_s14 = spop %1491 }
 0xbb6   : > { %v1190_v38 = vstv %s1492_s14 }
 0xbb7   : > { %v1191_v10 = vmul.f32 0.001953125, %v1190_v38 }
 0xbb9   : > { %v1192_v22 = vadd.f32 1e-05, %v1191_v10 }
 0xbbb   : > { %1587 = vrsqrt.f32 %v1192_v22 }
 0xbc5   : > { %v1588_v18 = vpop.eup %1587 }
 0xbc6   : > { %v1194_v19 = vmul.f32 %v1588_v18, %v1168_v39  ;;  %v1195_v53 = vmul.f32 %v1588_v18, %v1169_v14 }
 0xbc8   : > { %v1200_v47 = vsel %vm799_vm11, %v1198_v40, %v1194_v19  ;;  %v1201_v56 = vsel %vm799_vm11, %v1199_v15, %v1195_v53 }
 0xbc9   : > { %v1206_v20 = vmul.f32 %v1204_v46, %v1200_v47  ;;  %v1207_v60 = vmul.f32 %v1204_v46, %v1201_v56 }
 0xbcb   : > { %v1212_v21 = vadd.f32 %v1210_v59, %v1206_v20  ;;  %v1213_v61 = vadd.f32 %v1210_v59, %v1207_v60 }
 0xbcd   : > { %v1214_v62 = vmul.f32 0.5, %v1212_v21  ;;  %v1215_v63 = vmul.f32 0.5, %v1213_v61 }
 0xbcf   : > { %1589 = vtanh.f32 %v1214_v62 }
 0xbd0   : > { %1591 = vtanh.f32 %v1215_v63 }
 0xbd9   : > { %v1590_v11 = vpop.eup %1589 }
 0xbda   : > { %v1592_v0 = vpop.eup %1591  ;;  %v1218_v54 = vmul.f32 0.5, %v1590_v11 }
 0xbdb   : > { %v1219_v55 = vmul.f32 0.5, %v1592_v0 }
 0xbdc   : > { %v1220_v1 = vadd.f32 0.5, %v1218_v54 }
 0xbdd   : > { %v1221_v35 = vadd.f32 0.5, %v1219_v55 }
 0xbde   : > { %v1222_v23 = vmul.f32 %v1220_v1, %v1212_v21 }
 0xbdf   : > { %v1223_v24 = vmul.f32 %v1221_v35, %v1213_v61 }
 0xbe0   : > { %v1307_v4 = vadd.f32 %v1303_v2, %v1222_v23 }
 0xbe1   : > { %v1308_v5 = vadd.f32 %v1305_v3, %v1223_v24 }
 0xbe2   : > { %1309 = vst [vmem:[%s299_s23] sm:$0xff] %v1307_v4 }
 0xbe3   : > { %1310 = vst [vmem:[%s299_s23 + $0x8] sm:$0xff] %v1308_v5 }
 0xbe4   : > { %1635 = shalt.err (!%p1632_p7)
}
 0xbe5   : > { %s1636_s18 = scalar_lea.hbm %s2230_s16, 256  ;;  %s1640_s20 = scalar_lea.hbm %s2279_s7, 512 }
 0xbe6   : > { %p1637_p8 = scmp.ne.s32.totalorder %s2230_s16, %s1636_s18  ;;  %p1641_p1 = scmp.lt.u32.totalorder %s2230_s16, %s2279_s7 }
 0xbe7   : > { %p1642_p0 = scmp.lt.u32.totalorder %s1640_s20, %s1636_s18  ;;  %p1644_p5 = scmp.lt.u32.totalorder %s1636_s18, %s2230_s16 }
 0xbe8   : > { %p1638_p11 = pnand %p1637_p8, %p2290_p9 }
 0xbe9   : > { %p1643_p6 = por %p1642_p0, %p1641_p1 }
 0xbea   : > { %p1639_p13 = pneg %p1638_p11 }
 0xbeb   : > { %p1645_p10 = por %p1644_p5, %p1643_p6 }
 0xbed   : > { %p1646_p12 = pnand %p1645_p10, %p1639_p13 }
 0xbef   : > { %1649 = shalt.err (!%p1646_p12)
}
 0xbf0   : > { %1497 = dma.vmem_to_hbm [thread:$0]  (%p2290_p9), %s2232_s29, 256, %s2230_s16, %s1312_s15  }
 0xbf1 PF: > { %p1509_p2 = scmp.ge.s32.totalorder %s1688_s27, 2  ;;  %s1338_s8 = sand.u32 1, %s1676_s24  }
 0xbf2   : > { %p2291_p3 = scmp.ne.s32.totalorder %s2284_s12, 0  ;;  %s1339_s9 = scalar_lea.sflag [#allocation5], %s1338_s8 }
 0xbf4   : > { %p1504_p4 = pnand %p1509_p2, %p2291_p3 }
 0xbf6   : > { %1671 = dma.done.wait (!%p1504_p4), %s1339_s9, 256  }
 0xbf7   : > { %1673 = vsyncadd (!%p1504_p4), %s1339_s9, 4294967040  ;;  %p18_p7 = scmp.ge.s32.totalorder %s1773_s30, 4   ;;  %s2292_s24 = smov %s1680_s25 }
 0xbf8   : > { %s2293_s25 = smov %s1684_s26  ;;  %s2294_s26 = smov %s1784_s10 }
 0xbf9   : > { %s2295_s27 = smov %s1773_s30  ;;  %20 = sbr.rel (!%p18_p7) target bundleno = 4 (0x4), region = 91 }
 0xc00   :  { %1344 = vsyncpa [#allocation4], 1 }
 0xc01   :  { %1346 = vsyncpa [#allocation4 + $0x1], 1 }
 0xc02   :  { %1347 = vsyncpa [#allocation5], 1 }
 0xc03   :  { %1349 = vsyncpa [#allocation5 + $0x1], 1 }

</bundles_post_ra>
